<compile_context>
chip_gen: v6e
topology: v6e:2x2x1
jax: 0.10.0
libtpu: 0.0.40
codegen_flags: <defaults>
</compile_context>

<pallas_src>
import functools
import numpy as np
import jax
import jax.numpy as jnp
from jax.experimental import pallas as pl
from jax.experimental.pallas import tpu as pltpu

MATMUL_DTYPE = jnp.bfloat16          # matmul-operand dtype (f32 accumulation everywhere)
ACT_DTYPE = MATMUL_DTYPE             # inter-kernel residual-stream dtype
_APPROX_RECIP = MATMUL_DTYPE != jnp.float32   # strict-parity mode -> exact divide


# ----------------------------------------------------------------------------
# Generation-aware tiling / VMEM helpers
# ----------------------------------------------------------------------------

@functools.lru_cache(maxsize=None)
def _vmem_limit_bytes():
    """Scoped-VMEM limit chosen per TPU generation (conservative, < physical)."""
    try:
        kind = jax.devices()[0].device_kind.lower()
    except Exception:
        return 32 * 1024 * 1024
    if "v7" in kind:
        return 40 * 1024 * 1024            # 64 MiB physical per TensorCore
    if "v5 lite" in kind or "v5e" in kind or "v6" in kind:
        return 64 * 1024 * 1024            # 128 MiB physical
    return 32 * 1024 * 1024


def _cparams(n_grid_axes):
    return pltpu.CompilerParams(
        dimension_semantics=("parallel",) * n_grid_axes,
        vmem_limit_bytes=_vmem_limit_bytes())


def _row_cap():
    return 1024 if _vmem_limit_bytes() >= 64 * 1024 * 1024 else 512


def _pick_row_tile(m, cap):
    """Largest multiple-of-8 divisor of m that is <= cap, preferring tiles that leave
    >= 2 grid steps (v7x has 2 TensorCores).  Falls back to m (single step).
    TODO(synk): awkward m (no multiple-of-8 divisor) would need pad + mask to tile."""
    best = None
    for t in range(8, min(cap, m) + 1, 8):
        if m % t:
            continue
        if m // t >= 2:
            best = t
        elif best is None:
            best = t
    return best if best is not None else m


def _pick_window_group(nw_total, ws2, dim, inner, hidden, batch):
    """Windows processed per grid step of the fused Swin-block kernel: largest divisor of
    nw_total whose live-value footprint fits a conservative budget, preferring >= 2 total
    grid steps so both v7x TensorCores get work."""
    per_row = 4 * (2 * dim + 3 * inner + hidden) * 3        # rough live f32 bytes / row
    row_budget = max(ws2, min(512, (_vmem_limit_bytes() // 4) // per_row))
    best = 1
    for wg in range(1, nw_total + 1):
        if nw_total % wg:
            continue
        steps = batch * (nw_total // wg)
        if wg * ws2 <= row_budget and (steps >= 2 or wg == 1):
            best = wg
    return best


# ----------------------------------------------------------------------------
# In-kernel math helpers
# ----------------------------------------------------------------------------

def _layernorm_f32(x, g, b):
    mu = jnp.mean(x, axis=-1, keepdims=True)
    var = jnp.mean(jnp.square(x - mu), axis=-1, keepdims=True)   # biased var (PyTorch LN)
    return (x - mu) * jax.lax.rsqrt(var + 1e-5) * g + b


def _gelu_tanh(x):
    # TODO(synk): nn.GELU default is exact erf; tanh approximation used (EUP-friendly).
    c = np.float32(np.sqrt(2.0 / np.pi))
    return 0.5 * x * (1.0 + jnp.tanh(c * (x + np.float32(0.044715) * x * x * x)))


# ----------------------------------------------------------------------------
# Pallas kernels
# ----------------------------------------------------------------------------

def _linear_bias_kernel(x_ref, w_ref, b_ref, o_ref):
    y = jnp.dot(x_ref[...].astype(w_ref.dtype), w_ref[...],
                preferred_element_type=jnp.float32)
    o_ref[...] = (y + b_ref[...]).astype(o_ref.dtype)


def _swin_block_kernel(x_ref, bias_ref, g1_ref, be1_ref, qkvw_ref, ow_ref, ob_ref,
                       g2_ref, be2_ref, w1_ref, fb1_ref, w2_ref, fb2_ref, o_ref,
                       *, heads, head_dim, scale, wg, ws2, approx_recip):
    """One grid step = `wg` whole windows of one batch image.  Fuses:
    LN1 + QKV + window attention + out-proj + residual + LN2 + MLP(GELU) + residual."""
    inner = heads * head_dim
    x = x_ref[...].astype(jnp.float32)                        # [WG*WS2, dim]

    # ---- LayerNorm1 + bias-free QKV projection ----
    xn = _layernorm_f32(x, g1_ref[...], be1_ref[...])
    qkv = jnp.dot(xn.astype(qkvw_ref.dtype), qkvw_ref[...],
                  preferred_element_type=jnp.float32)         # [WG*WS2, 3*inner]
    qkv = qkv.reshape(wg, ws2, 3 * inner)                     # free: WS2 multiple of 8
    bias = bias_ref[...].astype(jnp.float32)                  # [WG, WS2, WS2]
    mm_dt = qkvw_ref.dtype

    # ---- multi-head window attention (heads unrolled; windows batched per einsum) ----
    head_outs = []
    for h in range(heads):
        q = qkv[:, :, h * head_dim:(h + 1) * head_dim].astype(mm_dt)
        k = qkv[:, :, inner + h * head_dim:inner + (h + 1) * head_dim].astype(mm_dt)
        v = qkv[:, :, 2 * inner + h * head_dim:2 * inner + (h + 1) * head_dim].astype(mm_dt)
        dots = jnp.einsum('wid,wjd->wij', q, k,
                          preferred_element_type=jnp.float32) * scale + bias
        m = jnp.max(dots, axis=-1, keepdims=True)
        p = jnp.exp(dots - m)
        den = jnp.sum(p, axis=-1, keepdims=True)
        if approx_recip:
            attn = p * pl.reciprocal(den, approx=True)        # divide on the EUP slot
        else:
            attn = p / den
        head_outs.append(jnp.einsum('wij,wjd->wid', attn.astype(mm_dt), v,
                                    preferred_element_type=jnp.float32))
    att = jnp.concatenate(head_outs, axis=-1).reshape(wg * ws2, inner)

    # ---- out-projection + bias + residual ----
    y1 = jnp.dot(att.astype(ow_ref.dtype), ow_ref[...],
                 preferred_element_type=jnp.float32) + ob_ref[...] + x

    # ---- LayerNorm2 + MLP(GELU) + residual ----
    yn = _layernorm_f32(y1, g2_ref[...], be2_ref[...])
    hmid = jnp.dot(yn.astype(w1_ref.dtype), w1_ref[...],
                   preferred_element_type=jnp.float32) + fb1_ref[...]
    hmid = _gelu_tanh(hmid)
    y2 = jnp.dot(hmid.astype(w2_ref.dtype), w2_ref[...],
                 preferred_element_type=jnp.float32) + fb2_ref[...] + y1

    o_ref[...] = y2.astype(o_ref.dtype)


# ----------------------------------------------------------------------------
# pallas_call wrappers
# ----------------------------------------------------------------------------

def linear_bias_pallas(x2d, w, b, out_dtype):
    M, K = x2d.shape
    N = w.shape[1]
    TM = _pick_row_tile(M, _row_cap())
    x_b = jnp.dtype(x2d.dtype).itemsize
    w_b = jnp.dtype(w.dtype).itemsize
    o_b = jnp.dtype(out_dtype).itemsize
    return pl.pallas_call(
        _linear_bias_kernel,
        out_shape=jax.ShapeDtypeStruct((M, N), out_dtype),
        grid=(M // TM,),
        in_specs=[pl.BlockSpec((TM, K), lambda i: (i, 0)),
                  pl.BlockSpec((K, N), lambda i: (0, 0)),
                  pl.BlockSpec((1, N), lambda i: (0, 0))],
        out_specs=pl.BlockSpec((TM, N), lambda i: (i, 0)),
        compiler_params=_cparams(1),
        cost_estimate=pl.CostEstimate(
            flops=int(2 * M * K * N), transcendentals=0,
            bytes_accessed=int(M * K * x_b + K * N * w_b + N * 4 + M * N * o_b)),
    )(x2d, w, b.reshape(1, N))


def swin_block_pallas(x, bias, p, *, heads, head_dim, ws):
    """x: [B, N, dim] window-major tokens; bias: [NW, WS2, WS2] combined attention bias."""
    B, N, dim = x.shape
    ws2 = ws * ws
    nw_total = N // ws2
    inner = heads * head_dim
    hidden = p['w1'].shape[1]
    wg = _pick_window_group(nw_total, ws2, dim, inner, hidden, B)
    rows = wg * ws2
    groups = nw_total // wg

    def const2(shape):
        return pl.BlockSpec(shape, lambda b, g: (0, 0))

    kern = functools.partial(
        _swin_block_kernel, heads=heads, head_dim=head_dim,
        scale=float(head_dim) ** (-0.5), wg=wg, ws2=ws2, approx_recip=_APPROX_RECIP)

    act_b = jnp.dtype(x.dtype).itemsize
    w_b = jnp.dtype(MATMUL_DTYPE).itemsize
    tokens = B * N
    flops = int(2 * tokens * (dim * 3 * inner + inner * dim + 2 * dim * hidden)
                + 4 * B * nw_total * heads * ws2 * ws2 * head_dim)
    trans = int(B * nw_total * heads * ws2 * ws2 + tokens * hidden)
    bytes_acc = int(2 * tokens * dim * act_b
                    + (dim * 3 * inner + inner * dim + 2 * dim * hidden) * w_b
                    + (nw_total * ws2 * ws2 + 6 * dim + hidden) * 4)

    return pl.pallas_call(
        kern,
        out_shape=jax.ShapeDtypeStruct((B, N, dim), x.dtype),
        grid=(B, groups),
        in_specs=[
            pl.BlockSpec((None, rows, dim), lambda b, g: (b, g, 0)),
            pl.BlockSpec((wg, ws2, ws2), lambda b, g: (g, 0, 0)),
            const2((1, dim)), const2((1, dim)),
            const2((dim, 3 * inner)),
            const2((inner, dim)), const2((1, dim)),
            const2((1, dim)), const2((1, dim)),
            const2((dim, hidden)), const2((1, hidden)),
            const2((hidden, dim)), const2((1, dim)),
        ],
        out_specs=pl.BlockSpec((None, rows, dim), lambda b, g: (b, g, 0)),
        compiler_params=_cparams(2),
        cost_estimate=pl.CostEstimate(flops=flops, transcendentals=trans,
                                      bytes_accessed=bytes_acc),
    )(x, bias,
      p['ln1_g'].reshape(1, dim), p['ln1_b'].reshape(1, dim),
      p['qkv_w'],
      p['out_w'], p['out_b'].reshape(1, dim),
      p['ln2_g'].reshape(1, dim), p['ln2_b'].reshape(1, dim),
      p['w1'], p['b1'].reshape(1, hidden),
      p['w2'], p['b2'].reshape(1, dim))


# ----------------------------------------------------------------------------
# Parameter construction (deterministic, synthetic)
# ----------------------------------------------------------------------------

def _create_mask(ws, disp, upper_lower, left_right):
    m = np.zeros((ws * ws, ws * ws), dtype=np.float32)
    if upper_lower:
        m[-disp * ws:, :-disp * ws] = -np.inf
        m[:-disp * ws, -disp * ws:] = -np.inf
    if left_right:
        m = m.reshape(ws, ws, ws, ws)
        m[:, -disp:, :, :-disp] = -np.inf
        m[:, :-disp, :, -disp:] = -np.inf
        m = m.reshape(ws * ws, ws * ws)
    return jnp.asarray(m)


def _relative_indices(ws):
    idx = np.array([[x, y] for x in range(ws) for y in range(ws)])
    return idx[None, :, :] - idx[:, None, :] + ws - 1     # [WS2, WS2, 2] in [0, 2ws-2]


def _init_linear(key, fan_in, fan_out, bias=True):
    kw, kb = jax.random.split(key)
    w = (jax.random.normal(kw, (fan_in, fan_out), jnp.float32) * 0.02).astype(MATMUL_DTYPE)
    b = (jax.random.normal(kb, (fan_out,), jnp.float32) * 0.02) if bias \
        else jnp.zeros((fan_out,), jnp.float32)
    return w, b


def make_swin_block_params(key, dim, heads, head_dim, mlp_dim, shifted, ws):
    ks = jax.random.split(key, 6)
    inner = heads * head_dim
    qkv_w, _ = _init_linear(ks[0], dim, inner * 3, bias=False)
    out_w, out_b = _init_linear(ks[1], inner, dim)
    w1, b1 = _init_linear(ks[2], dim, mlp_dim)
    w2, b2 = _init_linear(ks[3], mlp_dim, dim)
    pos_table = jax.random.normal(ks[4], (2 * ws - 1, 2 * ws - 1), jnp.float32)
    rel = _relative_indices(ws)
    pos_bias = pos_table[rel[..., 0], rel[..., 1]]        # [WS2, WS2] (shared over heads)
    p = dict(
        ln1_g=jnp.ones((dim,), jnp.float32), ln1_b=jnp.zeros((dim,), jnp.float32),
        ln2_g=jnp.ones((dim,), jnp.float32), ln2_b=jnp.zeros((dim,), jnp.float32),
        qkv_w=qkv_w, out_w=out_w, out_b=out_b,
        w1=w1, b1=b1, w2=w2, b2=b2,
        pos_bias=pos_bias, shifted=shifted,
    )
    if shifted:
        d = ws // 2
        p['ul_mask'] = _create_mask(ws, d, upper_lower=True, left_right=False)
        p['lr_mask'] = _create_mask(ws, d, upper_lower=False, left_right=True)
    return p


def make_encoder_layer_params(key, in_channels, hidden_dim, layers, df,
                              heads, head_dim, ws):
    assert layers % 2 == 0
    keys = jax.random.split(key, 1 + layers)
    pm_w, pm_b = _init_linear(keys[0], in_channels * df * df, hidden_dim)
    blocks = []
    k_i = 1
    for _ in range(layers // 2):
        reg = make_swin_block_params(keys[k_i], hidden_dim, heads, head_dim,
                                     hidden_dim * 4, False, ws); k_i += 1
        shf = make_swin_block_params(keys[k_i], hidden_dim, heads, head_dim,
                                     hidden_dim * 4, True, ws); k_i += 1
        blocks.append((reg, shf))
    return dict(pm_w=pm_w, pm_b=pm_b, blocks=blocks,
                df=df, heads=heads, head_dim=head_dim, ws=ws)


# ----------------------------------------------------------------------------
# Forward-pass plumbing
# ----------------------------------------------------------------------------

def _combined_bias(p, nw_h, nw_w, ws2):
    """Relative-position bias replicated per window, with the shifted-window masks folded
    into the last window row / column (matches dots[:, :, -nw_w:] / [:, :, nw_w-1::nw_w])."""
    bias = jnp.tile(p['pos_bias'][None, None], (nw_h, nw_w, 1, 1))
    if p['shifted']:
        bias = bias.at[-1, :, :, :].add(p['ul_mask'])
        bias = bias.at[:, -1, :, :].add(p['lr_mask'])
    return bias.reshape(nw_h * nw_w, ws2, ws2)


def _shift_perms(H, W, ws):
    """Row permutations (in window-major token order) implementing the cyclic shift by
    -ws//2 (fwd) and its inverse +ws//2 (bwd)."""
    d = ws // 2
    nw_w = W // ws

    def wm(i, j):
        r, u = divmod(i, ws)
        c, v = divmod(j, ws)
        return ((r * nw_w + c) * ws + u) * ws + v

    N = H * W
    fwd = np.empty((N,), np.int32)
    bwd = np.empty((N,), np.int32)
    for i in range(H):
        for j in range(W):
            t = wm(i, j)
            fwd[t] = wm((i + d) % H, (j + d) % W)
            bwd[t] = wm((i - d) % H, (j - d) % W)
    return jnp.asarray(fwd), jnp.asarray(bwd)


def encoder_layer_forward(x_nchw, params):
    B, C, H0, W0 = x_nchw.shape
    df, heads, head_dim, ws = params['df'], params['heads'], params['head_dim'], params['ws']
    nh, nw = H0 // df, W0 // df
    nw_h, nw_w = nh // ws, nw // ws
    assert nw_h * ws == nh and nw_w * ws == nw, "spatial size must be divisible by window"
    ws2 = ws * ws
    N = nw_h * nw_w * ws2

    # PatchMerging (Unfold k=df,s=df + Linear).  Tokens are emitted directly in
    # window-major order (b, win_row, win_col, in_row, in_col) so no further relayout is
    # needed between the fused Swin-block kernels; features keep the (c, kh, kw) Unfold order.
    xp = x_nchw.reshape(B, C, nw_h, ws, df, nw_w, ws, df)
    xp = xp.transpose(0, 2, 5, 3, 6, 1, 4, 7).reshape(B * N, C * df * df)
    x = linear_bias_pallas(xp.astype(ACT_DTYPE), params['pm_w'], params['pm_b'],
                           out_dtype=ACT_DTYPE)
    x = x.reshape(B, N, -1)

    # TODO(synk): the cyclic shift wraps around the spatial grid, which a rectangular
    # BlockSpec index_map cannot express; it is realized as one XLA row-gather per
    # direction per shifted block (the only inter-kernel relayout left in the stage).
    perm_fwd, perm_bwd = _shift_perms(nh, nw, ws)

    for reg, shf in params['blocks']:
        x = swin_block_pallas(x, _combined_bias(reg, nw_h, nw_w, ws2), reg,
                              heads=heads, head_dim=head_dim, ws=ws)
        xs = jnp.take(x, perm_fwd, axis=1)
        xs = swin_block_pallas(xs, _combined_bias(shf, nw_h, nw_w, ws2), shf,
                               heads=heads, head_dim=head_dim, ws=ws)
        x = jnp.take(xs, perm_bwd, axis=1)

    # window-major tokens -> NCHW
    dim = x.shape[-1]
    out = x.astype(jnp.float32).reshape(B, nw_h, nw_w, ws, ws, dim)
    out = out.transpose(0, 5, 1, 3, 2, 4).reshape(B, dim, nh, nw)
    return out


# ----------------------------------------------------------------------------
# Main
# ----------------------------------------------------------------------------

if __name__ == "__main__":
    in_channels, hidden_dim, layers = 4, 32, 2
    downscaling_factor, num_heads, head_dim, window_size = 2, 2, 8, 4

    key = jax.random.PRNGKey(0)
    kx, kp = jax.random.split(key)
    x = jax.random.normal(kx, (2, in_channels, 16, 16), jnp.float32)   # NCHW

    params = make_encoder_layer_params(kp, in_channels, hidden_dim, layers,
                                       downscaling_factor, num_heads, head_dim,
                                       window_size)

    fwd = jax.jit(lambda inp: encoder_layer_forward(inp, params))
    out = jax.block_until_ready(fwd(x))
    assert out.shape == (2, hidden_dim, 16 // downscaling_factor, 16 // downscaling_factor)
    assert bool(jnp.all(jnp.isfinite(out)))
    print("KERNEL_OK")
</pallas_src>

<mosaic_0001>
module attributes {stable_mosaic.version = 11 : i64} {
  func.func @_linear_bias_kernel(%arg0: i32, %arg1: memref<64x16xbf16, #tpu.memory_space<vmem>>, %arg2: memref<16x32xbf16, #tpu.memory_space<vmem>>, %arg3: memref<1x32xf32, #tpu.memory_space<vmem>>, %arg4: memref<64x32xbf16, #tpu.memory_space<vmem>>) attributes {dimension_semantics = [#tpu.dimension_semantics<parallel>], iteration_bounds = array<i64: 2>, scalar_prefetch = 0 : i64, scratch_operands = 0 : i64, tpu.core_type = #tpu.core_type<tc>, window_params = [{transform_indices = @transform_0, window_bounds = array<i64: 64, 16>}, {pipeline_mode = #tpu.pipeline_mode<synchronous>, transform_indices = @transform_1, window_bounds = array<i64: 16, 32>}, {pipeline_mode = #tpu.pipeline_mode<synchronous>, transform_indices = @transform_2, window_bounds = array<i64: 1, 32>}, {transform_indices = @transform_3, window_bounds = array<i64: 64, 32>}]} {
    %c0 = arith.constant 0 : index
    %c0_0 = arith.constant 0 : index
    %0 = vector.load %arg1[%c0, %c0_0] : memref<64x16xbf16, #tpu.memory_space<vmem>>, vector<64x16xbf16>
    %c0_1 = arith.constant 0 : index
    %c0_2 = arith.constant 0 : index
    %1 = vector.load %arg2[%c0_1, %c0_2] : memref<16x32xbf16, #tpu.memory_space<vmem>>, vector<16x32xbf16>
    %cst = arith.constant dense<0.000000e+00> : vector<64x32xf32>
    %2 = tpu.matmul %0, %1, %cst {dimension_numbers = #tpu.dot_dimension_numbers<[1], [0], [0], [1], [0, 0, 1, 1], [], []>} : vector<64x16xbf16>, vector<16x32xbf16>, vector<64x32xf32> -> vector<64x32xf32>
    %c0_3 = arith.constant 0 : index
    %c0_4 = arith.constant 0 : index
    %3 = vector.load %arg3[%c0_3, %c0_4] : memref<1x32xf32, #tpu.memory_space<vmem>>, vector<1x32xf32>
    %4 = vector.broadcast %3 : vector<1x32xf32> to vector<64x32xf32>
    %5 = arith.addf %2, %4 : vector<64x32xf32>
    %6 = arith.truncf %5 : vector<64x32xf32> to vector<64x32xbf16>
    %c0_5 = arith.constant 0 : index
    %c0_6 = arith.constant 0 : index
    %7 = vector.load %arg4[%c0_5, %c0_6] : memref<64x32xbf16, #tpu.memory_space<vmem>>, vector<64x32xbf16>
    tpu.vector_store %arg4[%c0_5, %c0_6], %6 {strides = array<i32>} : memref<64x32xbf16, #tpu.memory_space<vmem>>, vector<64x32xbf16>,
    return
  }
  func.func @transform_0(%arg0: i32) -> (i32, i32) {
    %c0_i32 = arith.constant 0 : i32
    %c0_i32_0 = arith.constant 0 : i32
    return %arg0, %c0_i32 : i32, i32
  }
  func.func @transform_1(%arg0: i32) -> (i32, i32) {
    %c0_i32 = arith.constant 0 : i32
    %c0_i32_0 = arith.constant 0 : i32
    %c0_i32_1 = arith.constant 0 : i32
    return %c0_i32, %c0_i32_0 : i32, i32
  }
  func.func @transform_2(%arg0: i32) -> (i32, i32) {
    %c0_i32 = arith.constant 0 : i32
    %c0_i32_0 = arith.constant 0 : i32
    %c0_i32_1 = arith.constant 0 : i32
    return %c0_i32, %c0_i32_0 : i32, i32
  }
  func.func @transform_3(%arg0: i32) -> (i32, i32) {
    %c0_i32 = arith.constant 0 : i32
    %c0_i32_0 = arith.constant 0 : i32
    return %arg0, %c0_i32 : i32, i32
  }
}

module attributes {stable_mosaic.version = 11 : i64} {
  func.func @_swin_block_kernel(%arg0: i32, %arg1: i32, %arg2: memref<1x64x32xbf16, #tpu.memory_space<vmem>>, %arg3: memref<4x16x16xf32, #tpu.memory_space<vmem>>, %arg4: memref<1x32xf32, #tpu.memory_space<vmem>>, %arg5: memref<1x32xf32, #tpu.memory_space<vmem>>, %arg6: memref<32x48xbf16, #tpu.memory_space<vmem>>, %arg7: memref<16x32xbf16, #tpu.memory_space<vmem>>, %arg8: memref<1x32xf32, #tpu.memory_space<vmem>>, %arg9: memref<1x32xf32, #tpu.memory_space<vmem>>, %arg10: memref<1x32xf32, #tpu.memory_space<vmem>>, %arg11: memref<32x128xbf16, #tpu.memory_space<vmem>>, %arg12: memref<1x128xf32, #tpu.memory_space<vmem>>, %arg13: memref<128x32xbf16, #tpu.memory_space<vmem>>, %arg14: memref<1x32xf32, #tpu.memory_space<vmem>>, %arg15: memref<1x64x32xbf16, #tpu.memory_space<vmem>>) attributes {dimension_semantics = [#tpu.dimension_semantics<parallel>, #tpu.dimension_semantics<parallel>], iteration_bounds = array<i64: 2, 1>, scalar_prefetch = 0 : i64, scratch_operands = 0 : i64, tpu.core_type = #tpu.core_type<tc>, window_params = [{transform_indices = @transform_0, window_bounds = array<i64: 1, 64, 32>}, {transform_indices = @transform_1, window_bounds = array<i64: 4, 16, 16>}, {pipeline_mode = #tpu.pipeline_mode<synchronous>, transform_indices = @transform_2, window_bounds = array<i64: 1, 32>}, {pipeline_mode = #tpu.pipeline_mode<synchronous>, transform_indices = @transform_3, window_bounds = array<i64: 1, 32>}, {pipeline_mode = #tpu.pipeline_mode<synchronous>, transform_indices = @transform_4, window_bounds = array<i64: 32, 48>}, {pipeline_mode = #tpu.pipeline_mode<synchronous>, transform_indices = @transform_5, window_bounds = array<i64: 16, 32>}, {pipeline_mode = #tpu.pipeline_mode<synchronous>, transform_indices = @transform_6, window_bounds = array<i64: 1, 32>}, {pipeline_mode = #tpu.pipeline_mode<synchronous>, transform_indices = @transform_7, window_bounds = array<i64: 1, 32>}, {pipeline_mode = #tpu.pipeline_mode<synchronous>, transform_indices = @transform_8, window_bounds = array<i64: 1, 32>}, {pipeline_mode = #tpu.pipeline_mode<synchronous>, transform_indices = @transform_9, window_bounds = array<i64: 32, 128>}, {pipeline_mode = #tpu.pipeline_mode<synchronous>, transform_indices = @transform_10, window_bounds = array<i64: 1, 128>}, {pipeline_mode = #tpu.pipeline_mode<synchronous>, transform_indices = @transform_11, window_bounds = array<i64: 128, 32>}, {pipeline_mode = #tpu.pipeline_mode<synchronous>, transform_indices = @transform_12, window_bounds = array<i64: 1, 32>}, {transform_indices = @transform_13, window_bounds = array<i64: 1, 64, 32>}]} {
    %c0 = arith.constant 0 : index
    %c0_0 = arith.constant 0 : index
    %c0_1 = arith.constant 0 : index
    %0 = vector.load %arg2[%c0, %c0_0, %c0_1] : memref<1x64x32xbf16, #tpu.memory_space<vmem>>, vector<1x64x32xbf16>
    %1 = vector.shape_cast %0 : vector<1x64x32xbf16> to vector<64x32xbf16>
    %2 = arith.extf %1 : vector<64x32xbf16> to vector<64x32xf32>
    %c0_2 = arith.constant 0 : index
    %c0_3 = arith.constant 0 : index
    %3 = vector.load %arg4[%c0_2, %c0_3] : memref<1x32xf32, #tpu.memory_space<vmem>>, vector<1x32xf32>
    %c0_4 = arith.constant 0 : index
    %c0_5 = arith.constant 0 : index
    %4 = vector.load %arg5[%c0_4, %c0_5] : memref<1x32xf32, #tpu.memory_space<vmem>>, vector<1x32xf32>
    %cst = arith.constant dense<0.000000e+00> : vector<64xf32>
    %5 = vector.multi_reduction <add>, %2, %cst [1] : vector<64x32xf32> to vector<64xf32>
    %6 = vector.shape_cast %5 : vector<64xf32> to vector<64x1xf32>
    %cst_6 = arith.constant 3.200000e+01 : f32
    %7 = vector.broadcast %cst_6 : f32 to vector<64x1xf32>
    %8 = arith.divf %6, %7 : vector<64x1xf32>
    %9 = vector.broadcast %8 : vector<64x1xf32> to vector<64x32xf32>
    %10 = arith.subf %2, %9 : vector<64x32xf32>
    %11 = arith.mulf %10, %10 : vector<64x32xf32>
    %cst_7 = arith.constant dense<0.000000e+00> : vector<64xf32>
    %12 = vector.multi_reduction <add>, %11, %cst_7 [1] : vector<64x32xf32> to vector<64xf32>
    %13 = vector.shape_cast %12 : vector<64xf32> to vector<64x1xf32>
    %cst_8 = arith.constant 3.200000e+01 : f32
    %14 = vector.broadcast %cst_8 : f32 to vector<64x1xf32>
    %15 = arith.divf %13, %14 : vector<64x1xf32>
    %16 = vector.broadcast %8 : vector<64x1xf32> to vector<64x32xf32>
    %17 = arith.subf %2, %16 : vector<64x32xf32>
    %cst_9 = arith.constant 9.99999974E-6 : f32
    %18 = vector.broadcast %cst_9 : f32 to vector<64x1xf32>
    %19 = arith.addf %15, %18 : vector<64x1xf32>
    %20 = math.rsqrt %19 : vector<64x1xf32>
    %21 = vector.broadcast %20 : vector<64x1xf32> to vector<64x32xf32>
    %22 = arith.mulf %17, %21 : vector<64x32xf32>
    %23 = vector.broadcast %3 : vector<1x32xf32> to vector<64x32xf32>
    %24 = arith.mulf %22, %23 : vector<64x32xf32>
    %25 = vector.broadcast %4 : vector<1x32xf32> to vector<64x32xf32>
    %26 = arith.addf %24, %25 : vector<64x32xf32>
    %27 = arith.truncf %26 : vector<64x32xf32> to vector<64x32xbf16>
    %c0_10 = arith.constant 0 : index
    %c0_11 = arith.constant 0 : index
    %28 = vector.load %arg6[%c0_10, %c0_11] : memref<32x48xbf16, #tpu.memory_space<vmem>>, vector<32x48xbf16>
    %cst_12 = arith.constant dense<0.000000e+00> : vector<64x48xf32>
    %29 = tpu.matmul %27, %28, %cst_12 {dimension_numbers = #tpu.dot_dimension_numbers<[1], [0], [0], [1], [0, 0, 1, 1], [], []>} : vector<64x32xbf16>, vector<32x48xbf16>, vector<64x48xf32> -> vector<64x48xf32>
    %30 = vector.shape_cast %29 : vector<64x48xf32> to vector<4x16x48xf32>
    %c0_13 = arith.constant 0 : index
    %c0_14 = arith.constant 0 : index
    %c0_15 = arith.constant 0 : index
    %31 = vector.load %arg3[%c0_13, %c0_14, %c0_15] : memref<4x16x16xf32, #tpu.memory_space<vmem>>, vector<4x16x16xf32>
    %32 = vector.extract_strided_slice %30 {offsets = [0, 0, 0], sizes = [4, 16, 8], strides = [1, 1, 1]} : vector<4x16x48xf32> to vector<4x16x8xf32>
    %33 = arith.truncf %32 : vector<4x16x8xf32> to vector<4x16x8xbf16>
    %34 = vector.extract_strided_slice %30 {offsets = [0, 0, 16], sizes = [4, 16, 8], strides = [1, 1, 1]} : vector<4x16x48xf32> to vector<4x16x8xf32>
    %35 = arith.truncf %34 : vector<4x16x8xf32> to vector<4x16x8xbf16>
    %36 = vector.extract_strided_slice %30 {offsets = [0, 0, 32], sizes = [4, 16, 8], strides = [1, 1, 1]} : vector<4x16x48xf32> to vector<4x16x8xf32>
    %37 = arith.truncf %36 : vector<4x16x8xf32> to vector<4x16x8xbf16>
    "tpu.trace_start"() <{level = 10 : i32, message = "wid,wjd->wij"}> : () -> ()
    %cst_16 = arith.constant dense<0.000000e+00> : vector<4x16x16xf32>
    %38 = tpu.matmul %33, %35, %cst_16 {dimension_numbers = #tpu.dot_dimension_numbers<[2], [2], [1], [1], [0, 0, 0, 1, 1, 1], [0], [0]>} : vector<4x16x8xbf16>, vector<4x16x8xbf16>, vector<4x16x16xf32> -> vector<4x16x16xf32>
    "tpu.trace_stop"() : () -> ()
    %cst_17 = arith.constant 0.353553385 : f32
    %39 = vector.broadcast %cst_17 : f32 to vector<4x16x16xf32>
    %40 = arith.mulf %38, %39 : vector<4x16x16xf32>
    %41 = arith.addf %40, %31 : vector<4x16x16xf32>
    %cst_18 = arith.constant dense<0xFF800000> : vector<4x16xf32>
    %42 = vector.multi_reduction <maximumf>, %41, %cst_18 [2] : vector<4x16x16xf32> to vector<4x16xf32>
    %43 = vector.shape_cast %42 : vector<4x16xf32> to vector<4x16x1xf32>
    %44 = vector.broadcast %43 : vector<4x16x1xf32> to vector<4x16x16xf32>
    %45 = arith.subf %41, %44 : vector<4x16x16xf32>
    %46 = math.exp %45 : vector<4x16x16xf32>
    %cst_19 = arith.constant dense<0.000000e+00> : vector<4x16xf32>
    %47 = vector.multi_reduction <add>, %46, %cst_19 [2] : vector<4x16x16xf32> to vector<4x16xf32>
    %48 = vector.shape_cast %47 : vector<4x16xf32> to vector<4x16x1xf32>
    %49 = tpu.reciprocal %48 {approx = true} : vector<4x16x1xf32> -> vector<4x16x1xf32>
    %50 = vector.broadcast %49 : vector<4x16x1xf32> to vector<4x16x16xf32>
    %51 = arith.mulf %46, %50 : vector<4x16x16xf32>
    %52 = arith.truncf %51 : vector<4x16x16xf32> to vector<4x16x16xbf16>
    "tpu.trace_start"() <{level = 10 : i32, message = "wij,wjd->wid"}> : () -> ()
    %cst_20 = arith.constant dense<0.000000e+00> : vector<4x16x8xf32>
    %53 = tpu.matmul %52, %37, %cst_20 {dimension_numbers = #tpu.dot_dimension_numbers<[2], [1], [1], [2], [0, 0, 0, 1, 1, 2], [0], [0]>} : vector<4x16x16xbf16>, vector<4x16x8xbf16>, vector<4x16x8xf32> -> vector<4x16x8xf32>
    "tpu.trace_stop"() : () -> ()
    %54 = vector.extract_strided_slice %30 {offsets = [0, 0, 8], sizes = [4, 16, 8], strides = [1, 1, 1]} : vector<4x16x48xf32> to vector<4x16x8xf32>
    %55 = arith.truncf %54 : vector<4x16x8xf32> to vector<4x16x8xbf16>
    %56 = vector.extract_strided_slice %30 {offsets = [0, 0, 24], sizes = [4, 16, 8], strides = [1, 1, 1]} : vector<4x16x48xf32> to vector<4x16x8xf32>
    %57 = arith.truncf %56 : vector<4x16x8xf32> to vector<4x16x8xbf16>
    %58 = vector.extract_strided_slice %30 {offsets = [0, 0, 40], sizes = [4, 16, 8], strides = [1, 1, 1]} : vector<4x16x48xf32> to vector<4x16x8xf32>
    %59 = arith.truncf %58 : vector<4x16x8xf32> to vector<4x16x8xbf16>
    "tpu.trace_start"() <{level = 10 : i32, message = "wid,wjd->wij"}> : () -> ()
    %cst_21 = arith.constant dense<0.000000e+00> : vector<4x16x16xf32>
    %60 = tpu.matmul %55, %57, %cst_21 {dimension_numbers = #tpu.dot_dimension_numbers<[2], [2], [1], [1], [0, 0, 0, 1, 1, 1], [0], [0]>} : vector<4x16x8xbf16>, vector<4x16x8xbf16>, vector<4x16x16xf32> -> vector<4x16x16xf32>
    "tpu.trace_stop"() : () -> ()
    %cst_22 = arith.constant 0.353553385 : f32
    %61 = vector.broadcast %cst_22 : f32 to vector<4x16x16xf32>
    %62 = arith.mulf %60, %61 : vector<4x16x16xf32>
    %63 = arith.addf %62, %31 : vector<4x16x16xf32>
    %cst_23 = arith.constant dense<0xFF800000> : vector<4x16xf32>
    %64 = vector.multi_reduction <maximumf>, %63, %cst_23 [2] : vector<4x16x16xf32> to vector<4x16xf32>
    %65 = vector.shape_cast %64 : vector<4x16xf32> to vector<4x16x1xf32>
    %66 = vector.broadcast %65 : vector<4x16x1xf32> to vector<4x16x16xf32>
    %67 = arith.subf %63, %66 : vector<4x16x16xf32>
    %68 = math.exp %67 : vector<4x16x16xf32>
    %cst_24 = arith.constant dense<0.000000e+00> : vector<4x16xf32>
    %69 = vector.multi_reduction <add>, %68, %cst_24 [2] : vector<4x16x16xf32> to vector<4x16xf32>
    %70 = vector.shape_cast %69 : vector<4x16xf32> to vector<4x16x1xf32>
    %71 = tpu.reciprocal %70 {approx = true} : vector<4x16x1xf32> -> vector<4x16x1xf32>
    %72 = vector.broadcast %71 : vector<4x16x1xf32> to vector<4x16x16xf32>
    %73 = arith.mulf %68, %72 : vector<4x16x16xf32>
    %74 = arith.truncf %73 : vector<4x16x16xf32> to vector<4x16x16xbf16>
    "tpu.trace_start"() <{level = 10 : i32, message = "wij,wjd->wid"}> : () -> ()
    %cst_25 = arith.constant dense<0.000000e+00> : vector<4x16x8xf32>
    %75 = tpu.matmul %74, %59, %cst_25 {dimension_numbers = #tpu.dot_dimension_numbers<[2], [1], [1], [2], [0, 0, 0, 1, 1, 2], [0], [0]>} : vector<4x16x16xbf16>, vector<4x16x8xbf16>, vector<4x16x8xf32> -> vector<4x16x8xf32>
    "tpu.trace_stop"() : () -> ()
    %76 = tpu.concatenate %53, %75 in 2 : vector<4x16x8xf32>, vector<4x16x8xf32> -> vector<4x16x16xf32>
    %77 = vector.shape_cast %76 : vector<4x16x16xf32> to vector<64x16xf32>
    %78 = arith.truncf %77 : vector<64x16xf32> to vector<64x16xbf16>
    %c0_26 = arith.constant 0 : index
    %c0_27 = arith.constant 0 : index
    %79 = vector.load %arg7[%c0_26, %c0_27] : memref<16x32xbf16, #tpu.memory_space<vmem>>, vector<16x32xbf16>
    %cst_28 = arith.constant dense<0.000000e+00> : vector<64x32xf32>
    %80 = tpu.matmul %78, %79, %cst_28 {dimension_numbers = #tpu.dot_dimension_numbers<[1], [0], [0], [1], [0, 0, 1, 1], [], []>} : vector<64x16xbf16>, vector<16x32xbf16>, vector<64x32xf32> -> vector<64x32xf32>
    %c0_29 = arith.constant 0 : index
    %c0_30 = arith.constant 0 : index
    %81 = vector.load %arg8[%c0_29, %c0_30] : memref<1x32xf32, #tpu.memory_space<vmem>>, vector<1x32xf32>
    %82 = vector.broadcast %81 : vector<1x32xf32> to vector<64x32xf32>
    %83 = arith.addf %80, %82 : vector<64x32xf32>
    %84 = arith.addf %83, %2 : vector<64x32xf32>
    %c0_31 = arith.constant 0 : index
    %c0_32 = arith.constant 0 : index
    %85 = vector.load %arg9[%c0_31, %c0_32] : memref<1x32xf32, #tpu.memory_space<vmem>>, vector<1x32xf32>
    %c0_33 = arith.constant 0 : index
    %c0_34 = arith.constant 0 : index
    %86 = vector.load %arg10[%c0_33, %c0_34] : memref<1x32xf32, #tpu.memory_space<vmem>>, vector<1x32xf32>
    %cst_35 = arith.constant dense<0.000000e+00> : vector<64xf32>
    %87 = vector.multi_reduction <add>, %84, %cst_35 [1] : vector<64x32xf32> to vector<64xf32>
    %88 = vector.shape_cast %87 : vector<64xf32> to vector<64x1xf32>
    %cst_36 = arith.constant 3.200000e+01 : f32
    %89 = vector.broadcast %cst_36 : f32 to vector<64x1xf32>
    %90 = arith.divf %88, %89 : vector<64x1xf32>
    %91 = vector.broadcast %90 : vector<64x1xf32> to vector<64x32xf32>
    %92 = arith.subf %84, %91 : vector<64x32xf32>
    %93 = arith.mulf %92, %92 : vector<64x32xf32>
    %cst_37 = arith.constant dense<0.000000e+00> : vector<64xf32>
    %94 = vector.multi_reduction <add>, %93, %cst_37 [1] : vector<64x32xf32> to vector<64xf32>
    %95 = vector.shape_cast %94 : vector<64xf32> to vector<64x1xf32>
    %cst_38 = arith.constant 3.200000e+01 : f32
    %96 = vector.broadcast %cst_38 : f32 to vector<64x1xf32>
    %97 = arith.divf %95, %96 : vector<64x1xf32>
    %98 = vector.broadcast %90 : vector<64x1xf32> to vector<64x32xf32>
    %99 = arith.subf %84, %98 : vector<64x32xf32>
    %cst_39 = arith.constant 9.99999974E-6 : f32
    %100 = vector.broadcast %cst_39 : f32 to vector<64x1xf32>
    %101 = arith.addf %97, %100 : vector<64x1xf32>
    %102 = math.rsqrt %101 : vector<64x1xf32>
    %103 = vector.broadcast %102 : vector<64x1xf32> to vector<64x32xf32>
    %104 = arith.mulf %99, %103 : vector<64x32xf32>
    %105 = vector.broadcast %85 : vector<1x32xf32> to vector<64x32xf32>
    %106 = arith.mulf %104, %105 : vector<64x32xf32>
    %107 = vector.broadcast %86 : vector<1x32xf32> to vector<64x32xf32>
    %108 = arith.addf %106, %107 : vector<64x32xf32>
    %109 = arith.truncf %108 : vector<64x32xf32> to vector<64x32xbf16>
    %c0_40 = arith.constant 0 : index
    %c0_41 = arith.constant 0 : index
    %110 = vector.load %arg11[%c0_40, %c0_41] : memref<32x128xbf16, #tpu.memory_space<vmem>>, vector<32x128xbf16>
    %cst_42 = arith.constant dense<0.000000e+00> : vector<64x128xf32>
    %111 = tpu.matmul %109, %110, %cst_42 {dimension_numbers = #tpu.dot_dimension_numbers<[1], [0], [0], [1], [0, 0, 1, 1], [], []>} : vector<64x32xbf16>, vector<32x128xbf16>, vector<64x128xf32> -> vector<64x128xf32>
    %c0_43 = arith.constant 0 : index
    %c0_44 = arith.constant 0 : index
    %112 = vector.load %arg12[%c0_43, %c0_44] : memref<1x128xf32, #tpu.memory_space<vmem>>, vector<1x128xf32>
    %113 = vector.broadcast %112 : vector<1x128xf32> to vector<64x128xf32>
    %114 = arith.addf %111, %113 : vector<64x128xf32>
    %cst_45 = arith.constant 5.000000e-01 : f32
    %115 = vector.broadcast %cst_45 : f32 to vector<64x128xf32>
    %116 = arith.mulf %115, %114 : vector<64x128xf32>
    %cst_46 = arith.constant 4.471500e-02 : f32
    %117 = vector.broadcast %cst_46 : f32 to vector<64x128xf32>
    %118 = arith.mulf %117, %114 : vector<64x128xf32>
    %119 = arith.mulf %118, %114 : vector<64x128xf32>
    %120 = arith.mulf %119, %114 : vector<64x128xf32>
    %121 = arith.addf %114, %120 : vector<64x128xf32>
    %cst_47 = arith.constant 0.797884583 : f32
    %122 = vector.broadcast %cst_47 : f32 to vector<64x128xf32>
    %123 = arith.mulf %122, %121 : vector<64x128xf32>
    %124 = math.tanh %123 : vector<64x128xf32>
    %cst_48 = arith.constant 1.000000e+00 : f32
    %125 = vector.broadcast %cst_48 : f32 to vector<64x128xf32>
    %126 = arith.addf %125, %124 : vector<64x128xf32>
    %127 = arith.mulf %116, %126 : vector<64x128xf32>
    %128 = arith.truncf %127 : vector<64x128xf32> to vector<64x128xbf16>
    %c0_49 = arith.constant 0 : index
    %c0_50 = arith.constant 0 : index
    %129 = vector.load %arg13[%c0_49, %c0_50] : memref<128x32xbf16, #tpu.memory_space<vmem>>, vector<128x32xbf16>
    %cst_51 = arith.constant dense<0.000000e+00> : vector<64x32xf32>
    %130 = tpu.matmul %128, %129, %cst_51 {dimension_numbers = #tpu.dot_dimension_numbers<[1], [0], [0], [1], [0, 0, 1, 1], [], []>} : vector<64x128xbf16>, vector<128x32xbf16>, vector<64x32xf32> -> vector<64x32xf32>
    %c0_52 = arith.constant 0 : index
    %c0_53 = arith.constant 0 : index
    %131 = vector.load %arg14[%c0_52, %c0_53] : memref<1x32xf32, #tpu.memory_space<vmem>>, vector<1x32xf32>
    %132 = vector.broadcast %131 : vector<1x32xf32> to vector<64x32xf32>
    %133 = arith.addf %130, %132 : vector<64x32xf32>
    %134 = arith.addf %133, %84 : vector<64x32xf32>
    %135 = arith.truncf %134 : vector<64x32xf32> to vector<64x32xbf16>
    %c0_54 = arith.constant 0 : index
    %c0_55 = arith.constant 0 : index
    %c0_56 = arith.constant 0 : index
    %136 = vector.load %arg15[%c0_54, %c0_55, %c0_56] : memref<1x64x32xbf16, #tpu.memory_space<vmem>>, vector<1x64x32xbf16>
    %137 = vector.shape_cast %136 : vector<1x64x32xbf16> to vector<64x32xbf16>
    %138 = vector.shape_cast %135 : vector<64x32xbf16> to vector<1x64x32xbf16>
    tpu.vector_store %arg15[%c0_54, %c0_55, %c0_56], %138 {strides = array<i32>} : memref<1x64x32xbf16, #tpu.memory_space<vmem>>, vector<1x64x32xbf16>,
    return
  }
  func.func @transform_0(%arg0: i32, %arg1: i32) -> (i32, i32, i32) {
    %c0_i32 = arith.constant 0 : i32
    %c0_i32_0 = arith.constant 0 : i32
    return %arg0, %arg1, %c0_i32 : i32, i32, i32
  }
  func.func @transform_1(%arg0: i32, %arg1: i32) -> (i32, i32, i32) {
    %c0_i32 = arith.constant 0 : i32
    %c0_i32_0 = arith.constant 0 : i32
    %c0_i32_1 = arith.constant 0 : i32
    return %arg1, %c0_i32, %c0_i32_0 : i32, i32, i32
  }
  func.func @transform_2(%arg0: i32, %arg1: i32) -> (i32, i32) {
    %c0_i32 = arith.constant 0 : i32
    %c0_i32_0 = arith.constant 0 : i32
    %c0_i32_1 = arith.constant 0 : i32
    return %c0_i32, %c0_i32_0 : i32, i32
  }
  func.func @transform_3(%arg0: i32, %arg1: i32) -> (i32, i32) {
    %c0_i32 = arith.constant 0 : i32
    %c0_i32_0 = arith.constant 0 : i32
    %c0_i32_1 = arith.constant 0 : i32
    return %c0_i32, %c0_i32_0 : i32, i32
  }
  func.func @transform_4(%arg0: i32, %arg1: i32) -> (i32, i32) {
    %c0_i32 = arith.constant 0 : i32
    %c0_i32_0 = arith.constant 0 : i32
    %c0_i32_1 = arith.constant 0 : i32
    return %c0_i32, %c0_i32_0 : i32, i32
  }
  func.func @transform_5(%arg0: i32, %arg1: i32) -> (i32, i32) {
    %c0_i32 = arith.constant 0 : i32
    %c0_i32_0 = arith.constant 0 : i32
    %c0_i32_1 = arith.constant 0 : i32
    return %c0_i32, %c0_i32_0 : i32, i32
  }
  func.func @transform_6(%arg0: i32, %arg1: i32) -> (i32, i32) {
    %c0_i32 = arith.constant 0 : i32
    %c0_i32_0 = arith.constant 0 : i32
    %c0_i32_1 = arith.constant 0 : i32
    return %c0_i32, %c0_i32_0 : i32, i32
  }
  func.func @transform_7(%arg0: i32, %arg1: i32) -> (i32, i32) {
    %c0_i32 = arith.constant 0 : i32
    %c0_i32_0 = arith.constant 0 : i32
    %c0_i32_1 = arith.constant 0 : i32
    return %c0_i32, %c0_i32_0 : i32, i32
  }
  func.func @transform_8(%arg0: i32, %arg1: i32) -> (i32, i32) {
    %c0_i32 = arith.constant 0 : i32
    %c0_i32_0 = arith.constant 0 : i32
    %c0_i32_1 = arith.constant 0 : i32
    return %c0_i32, %c0_i32_0 : i32, i32
  }
  func.func @transform_9(%arg0: i32, %arg1: i32) -> (i32, i32) {
    %c0_i32 = arith.constant 0 : i32
    %c0_i32_0 = arith.constant 0 : i32
    %c0_i32_1 = arith.constant 0 : i32
    return %c0_i32, %c0_i32_0 : i32, i32
  }
  func.func @transform_10(%arg0: i32, %arg1: i32) -> (i32, i32) {
    %c0_i32 = arith.constant 0 : i32
    %c0_i32_0 = arith.constant 0 : i32
    %c0_i32_1 = arith.constant 0 : i32
    return %c0_i32, %c0_i32_0 : i32, i32
  }
  func.func @transform_11(%arg0: i32, %arg1: i32) -> (i32, i32) {
    %c0_i32 = arith.constant 0 : i32
    %c0_i32_0 = arith.constant 0 : i32
    %c0_i32_1 = arith.constant 0 : i32
    return %c0_i32, %c0_i32_0 : i32, i32
  }
  func.func @transform_12(%arg0: i32, %arg1: i32) -> (i32, i32) {
    %c0_i32 = arith.constant 0 : i32
    %c0_i32_0 = arith.constant 0 : i32
    %c0_i32_1 = arith.constant 0 : i32
    return %c0_i32, %c0_i32_0 : i32, i32
  }
  func.func @transform_13(%arg0: i32, %arg1: i32) -> (i32, i32, i32) {
    %c0_i32 = arith.constant 0 : i32
    %c0_i32_0 = arith.constant 0 : i32
    return %arg0, %arg1, %c0_i32 : i32, i32, i32
  }
}

</mosaic_0001>

<bundles_post_ra>
// kernel: _lambda_.3
= control target key start
LH: loop header
LB: loop body
LE: loop exit
PB: predicated region body
PF: predicated region fallthrough
CT: control target
= control target key end

     0   :  { %s488_s12 = smov 0   ;;  %s519_s0 = inlined_call_operand.vmem [shape: bf16[128,16], index: 0, kind: input, shape index: {}]   ;;  %s520_s1 = inlined_call_operand.vmem [shape: bf16[16,32], index: 1, kind: input, shape index: {}]   ;;  %s521_s2 = inlined_call_operand.vmem [shape: f32[1,32], index: 2, kind: input, shape index: {}]   ;;  %s522_s3 = inlined_call_operand.vmem [shape: bf16[128,32], index: 3, kind: output, shape index: {}]  }
   0x1 LB: > { %s393_s13 = sadd.s32 4294967295, %s466_s12   ;;  %p397_p0 = scmp.ge.s32.totalorder %s466_s12, 1  ;;  %s466_s12 = sphi %s488_s12, %s13_s12  }
   0x2   : > { %p138_p1 = scmp.lt.s32.totalorder %s466_s12, 3 }
   0x4   : > { %p139_p2 = pnand %p397_p0, %p138_p1 }
   0x5   : > { %s398_s16 = sshll.u32 (!%p139_p2), %s393_s13, 3 }
   0x6   : > { %142 = sbr.rel (%p139_p2) target bundleno = 220 (0xdc), region = 32  ;;  %p163_p3 = scmp.lt.s32.totalorder (!%p139_p2), %s398_s16, 15 }
   0xb   : > { %v455_v0 = vld [vmem:[%s520_s1] sm:$0xff]   ;;  %s524_s16 = smov (!%p163_p3, %s398_s16), 15  ;;  %vm218_vm0 = vcmask 130048   ;;  %vm328_vm1 = vcmask 257024  }
   0xc   : > { %435 = vmatprep.subr.bf16.mxu0 %v455_v0  ;;  %445 = vmatprep.subr.bf16.mxu1 %v455_v0  ;;  %s399_s17 = sshll.u32 %s524_s16, 2  ;;  %v402_v5 = vld [vmem:[%s521_s2] ss:$0 sm:$0xff] }
   0xd   : > { %436 = vmatpush3.bf16.msra.mxu0 %v455_v0  ;;  %446 = vmatpush3.bf16.msra.mxu1 %v455_v0  ;;  %s166_s20 = scalar_lea.vmem %s519_s0, %s399_s17  ;;  %s172_s25 = scalar_lea.vmem %s522_s3, %s399_s17 }
   0xe   : > { %v456_v1 = vld [vmem:[%s166_s20] sm:$0xff]   ;;  %v457_v2 = vld [vmem:[%s166_s20 + $0x10] sm:$0xff]   ;;  %v458_v3 = vld [vmem:[%s166_s20 + $0x8] sm:$0xff]  }
   0xf   : > { %437 = vmatprep.mubr.msk.bf16.mxu0 %vm218_vm0, %v456_v1  ;;  %441 = vmatprep.mubr.msk.bf16.mxu1 %vm218_vm0, %v457_v2  ;;  %v459_v4 = vld [vmem:[%s166_s20 + $0x18] sm:$0xff]  }
  0x10   : > { %438 = vmatmul.mubr.msk.bf16.vlgmr.msra.gmra.mxu0 %vm218_vm0, %v458_v3  ;;  %442 = vmatmul.mubr.msk.bf16.vlgmr.msra.gmra.mxu1 %vm218_vm0, %v459_v4 }
  0xd0   : > { %v439_v6 = vpop.f32.mrf.mxu0  ;;  %v443_v8 = vpop.f32.mrf.mxu1 }
  0xd1   : > { %v274_v7 = vadd.f32 %v439_v6, %v402_v5  ;;  %v290_v9 = vadd.f32 %v443_v8, %v402_v5 }
  0xd2   : > { %v265_v10 = vpop.f32.mrf.mxu0  ;;  %v281_v13 = vpop.f32.mrf.mxu1 }
  0xd3   : > { %v424_v11 = vpack.c.bf16 %v274_v7, %v274_v7  ;;  %v266_v12 = vadd.f32 %v402_v5, %v265_v10  ;;  %v428_v14 = vpack.c.bf16 %v290_v9, %v290_v9  ;;  %v282_v15 = vadd.f32 %v402_v5, %v281_v13 }
  0xd4   : > { %v440_v16 = vpop.f32.mrf.mxu0  ;;  %v444_v19 = vpop.f32.mrf.mxu1 }
  0xd5   : > { %331 = vst.msk [vmem:[%s172_s25 + $0x8] sm:$0xf] %vm328_vm1, %v424_v11  ;;  %v422_v17 = vpack.c.bf16 %v266_v12, %v266_v12  ;;  %v277_v18 = vadd.f32 %v440_v16, %v402_v5  ;;  %335 = vst.msk [vmem:[%s172_s25 + $0x18] sm:$0xf] %vm328_vm1, %v428_v14  ;;  %v426_v20 = vpack.c.bf16 %v282_v15, %v282_v15 }
  0xd6   : > { %v293_v21 = vadd.f32 %v444_v19, %v402_v5  ;;  %v268_v22 = vpop.f32.mrf.mxu0  ;;  %v284_v25 = vpop.f32.mrf.mxu1 }
  0xd7   : > { %329 = vst.msk [vmem:[%s172_s25] sm:$0xf] %vm328_vm1, %v422_v17  ;;  %v425_v23 = vpack.c.bf16 %v277_v18, %v277_v18  ;;  %v269_v24 = vadd.f32 %v402_v5, %v268_v22  ;;  %333 = vst.msk [vmem:[%s172_s25 + $0x10] sm:$0xf] %vm328_vm1, %v426_v20  ;;  %v285_v27 = vadd.f32 %v402_v5, %v284_v25 }
  0xd8   : > { %v429_v26 = vpack.c.bf16 %v293_v21, %v293_v21 }
  0xd9   : > { %332 = vst.msk [vmem:[%s172_s25 + $0xc] sm:$0xf] %vm328_vm1, %v425_v23  ;;  %v423_v28 = vpack.c.bf16 %v269_v24, %v269_v24  ;;  %v427_v29 = vpack.c.bf16 %v285_v27, %v285_v27 }
  0xda   : > { %336 = vst.msk [vmem:[%s172_s25 + $0x1c] sm:$0xf] %vm328_vm1, %v429_v26 }
  0xdb   : > { %330 = vst.msk [vmem:[%s172_s25 + $0x4] sm:$0xf] %vm328_vm1, %v423_v28  ;;  %334 = vst.msk [vmem:[%s172_s25 + $0x14] sm:$0xf] %vm328_vm1, %v427_v29 }
  0xdc PF: > { %s13_s12 = sadd.s32 1, %s466_s12  }
  0xdd   : > { %p10_p4 = scmp.ge.s32.totalorder %s13_s12, 4  }
  0xdf   :  { %12 = sbr.rel (!%p10_p4) target bundleno = 1 (0x1), region = 62 }

// kernel: _lambda_.4
= control target key start
LH: loop header
LB: loop body
LE: loop exit
PB: predicated region body
PF: predicated region fallthrough
CT: control target
= control target key end

     0   :  { %s3101_s25 = smov 0   ;;  %s3103_s26 = smov 0   ;;  %s3685_s0 = inlined_call_operand.vmem [shape: bf16[2,64,32], index: 0, kind: input, shape index: {}]   ;;  %s3686_s1 = inlined_call_operand.vmem [shape: f32[4,16,16], index: 1, kind: input, shape index: {}]   ;;  %s3687_s2 = inlined_call_operand.vmem [shape: f32[1,32], index: 2, kind: input, shape index: {}, may-alias: {2,7}]   ;;  %s3688_s3 = inlined_call_operand.vmem [shape: f32[1,32], index: 3, kind: input, shape index: {}, may-alias: {3,8}]   ;;  %s3689_s4 = inlined_call_operand.vmem [shape: bf16[32,48], index: 4, kind: input, shape index: {}]   ;;  %s3690_s5 = inlined_call_operand.vmem [shape: bf16[16,32], index: 5, kind: input, shape index: {}]   ;;  %s3691_s6 = inlined_call_operand.vmem [shape: f32[1,32], index: 6, kind: input, shape index: {}]   ;;  %s3692_s7 = inlined_call_operand.vmem [shape: f32[1,32], index: 7, kind: input, shape index: {}, may-alias: {2,7}]   ;;  %s3693_s8 = inlined_call_operand.vmem [shape: f32[1,32], index: 8, kind: input, shape index: {}, may-alias: {3,8}]   ;;  %s3694_s9 = inlined_call_operand.vmem [shape: bf16[32,128], index: 9, kind: input, shape index: {}]   ;;  %s3695_s10 = inlined_call_operand.vmem [shape: f32[1,128], index: 10, kind: input, shape index: {}]   ;;  %s3696_s11 = inlined_call_operand.vmem [shape: bf16[128,32], index: 11, kind: input, shape index: {}]   ;;  %s3697_s12 = inlined_call_operand.vmem [shape: f32[1,32], index: 12, kind: input, shape index: {}]   ;;  %s3698_s13 = inlined_call_operand.vmem [shape: bf16[2,64,32], index: 13, kind: output, shape index: {}]  }
   0x1   :  { %s3105_s27 = smov 0  }
   0x2 LB: > { %s35_s28 = sadd.s32 1, %s3017_s26  ;;  %p2515_p0 = scmp.ge.s32.totalorder %s3021_s27, 1  ;;  %s3021_s27 = sphi %s3105_s27, %s23_s27   ;;  %s3017_s26 = sphi %s3103_s26, %s3700_s26   ;;  %s3013_s25 = sphi %s3101_s25, %s3699_s25  }
   0x3   : > { %p37_p1 = scmp.ge.s32.totalorder %s35_s28, 2  ;;  %p420_p2 = scmp.lt.s32.totalorder %s3021_s27, 3 }
   0x5   : > { %s3702_s28 = smov (%p37_p1, %s35_s28), 0  ;;  %p421_p3 = pnand %p2515_p0, %p420_p2 }
   0x6   : > { %p479_p4 = scmp.lt.s32.totalorder (!%p421_p3), %s3013_s25, 1  ;;  %s3025_s24 = smov (!%p421_p3), 112  }
   0x7   : > { %424 = sbr.rel (%p421_p3) target bundleno = 3098 (0xc1a), region = 72  ;;  %s3027_s18 = smov (!%p421_p3), 104  }
   0x8   : > { %s3028_s19 = smov (!%p421_p3), 120   ;;  %s3029_s20 = smov (!%p421_p3), 88  }
   0x9   : > { %s3030_s23 = smov (!%p421_p3), 8  }
   0xc   : > { %s3704_s25 = smov (!%p479_p4, %s3013_s25), 1  ;;  %vm524_vm0 = vcmask 261120   ;;  %v2874_v60 = vld [vmem:[%s3689_s4 + $0x8] sm:$0xff]   ;;  %v2875_v61 = vld [vmem:[%s3689_s4] sm:$0xff]   ;;  %vm3024_vm1 = vmmov 0   ;;  %vm770_vm2 = vcmask 64512  }
   0xd   : > { %s2578_s29 = sshll.u32 %s3704_s25, 5  ;;  %2668 = vmatprep.subr.bf16.mxu1 %v2874_v60  ;;  %vm984_vm3 = vcmask 130048   ;;  %vm2399_vm4 = vcmask 257024  }
   0xe   : > { %s486_s15 = scalar_lea.vmem %s3685_s0, %s2578_s29  ;;  %2669 = vmatpush3.bf16.msra.mxu1 %v2874_v60 }
   0xf   : > { %v2589_v0 = vld [vmem:[%s486_s15] sm:$0xff]   ;;  %v2604_v1 = vld [vmem:[%s486_s15 + $0x8] sm:$0xff]   ;;  %v2605_v6 = vld [vmem:[%s486_s15 + $0x10] sm:$0xff]   ;;  %2670 = vmatprep.subr.bf16.mxu1 %v2875_v61 }
  0x10   : > { %v3127_v2 = vunpack.c.l.bf16 %v2589_v0  ;;  %v3129_v3 = vunpack.c.l.bf16 %v2604_v1  ;;  %v3131_v4 = vunpack.c.h.bf16 %v2589_v0  ;;  %v3133_v5 = vunpack.c.h.bf16 %v2604_v1  ;;  %v2606_v13 = vld [vmem:[%s486_s15 + $0x18] sm:$0xff]   ;;  %s3026_s15 = smov 96  }
  0x11   : > { %v3143_v11 = vunpack.c.l.bf16 %v2605_v6  ;;  %v3145_v12 = vunpack.c.h.bf16 %v2605_v6  ;;  %v3151_v16 = vunpack.c.l.bf16 %v2606_v13  ;;  %v3153_v17 = vunpack.c.h.bf16 %v2606_v13 }
  0x12   : > { %v525_v7 = vsel %vm524_vm0, %v3127_v2, 0.0  ;;  %v531_v8 = vsel %vm524_vm0, %v3129_v3, 0.0  ;;  %v528_v9 = vsel %vm524_vm0, %v3131_v4, 0.0  ;;  %v534_v10 = vsel %vm524_vm0, %v3133_v5, 0.0  ;;  %2671 = vmatpush3.bf16.msra.mxu1 %v2875_v61 }
  0x13   : > { %526 = vadd.xlane.f32.xlu0 %v525_v7  ;;  %532 = vadd.xlane.f32.xlu1 %v531_v8  ;;  %v537_v14 = vsel %vm524_vm0, %v3143_v11, 0.0  ;;  %v540_v15 = vsel %vm524_vm0, %v3145_v12, 0.0  ;;  %v543_v18 = vsel %vm524_vm0, %v3151_v16, 0.0  ;;  %v546_v19 = vsel %vm524_vm0, %v3153_v17, 0.0 }
  0x17   : > { %529 = vadd.xlane.f32.xlu0 %v528_v9  ;;  %535 = vadd.xlane.f32.xlu1 %v534_v10 }
  0x1b   : > { %538 = vadd.xlane.f32.xlu0 %v537_v14  ;;  %541 = vadd.xlane.f32.xlu1 %v540_v15 }
  0x1f   : > { %544 = vadd.xlane.f32.xlu0 %v543_v18  ;;  %547 = vadd.xlane.f32.xlu1 %v546_v19 }
  0x9c   : > { %v527_v20 = vpop.xlane.xlu0 %526  ;;  %v533_v21 = vpop.xlane.xlu1 %532 }
  0x9d   : > { %v550_v22 = vmul.f32 0.03125, %v527_v20  ;;  %v552_v23 = vmul.f32 0.03125, %v533_v21 }
  0x9f   : > { %v3160_v24 = vsub.f32 %v3127_v2, %v550_v22  ;;  %v3163_v25 = vsub.f32 %v3129_v3, %v552_v23 }
  0xa0   : > { %v530_v26 = vpop.xlane.xlu0 %529  ;;  %v536_v27 = vpop.xlane.xlu1 %535 }
  0xa1   : > { %v551_v28 = vmul.f32 0.03125, %v530_v26  ;;  %v553_v29 = vmul.f32 0.03125, %v536_v27  ;;  %v566_v30 = vmul.f32 %v3160_v24, %v3160_v24  ;;  %v568_v31 = vmul.f32 %v3163_v25, %v3163_v25 }
  0xa3   : > { %v3170_v32 = vsub.f32 %v3131_v4, %v551_v28  ;;  %v3173_v33 = vsub.f32 %v3133_v5, %v553_v29  ;;  %v574_v34 = vsel %vm524_vm0, %v566_v30, 0.0  ;;  %v580_v37 = vsel %vm524_vm0, %v568_v31, 0.0 }
  0xa4   : > { %575 = vadd.xlane.f32.xlu0 %v574_v34  ;;  %v539_v35 = vpop.xlane.xlu0 %538  ;;  %v542_v36 = vpop.xlane.xlu1 %541 }
  0xa5   : > { %v554_v38 = vmul.f32 0.03125, %v539_v35  ;;  %v555_v39 = vmul.f32 0.03125, %v542_v36  ;;  %v567_v40 = vmul.f32 %v3170_v32, %v3170_v32  ;;  %v569_v41 = vmul.f32 %v3173_v33, %v3173_v33  ;;  %v2520_v36 = vld [vmem:[%s3687_s2] ss:$0 sm:$0xff] }
  0xa7   : > { %v3182_v42 = vsub.f32 %v3143_v11, %v554_v38  ;;  %v3185_v43 = vsub.f32 %v3145_v12, %v555_v39  ;;  %v577_v44 = vsel %vm524_vm0, %v567_v40, 0.0  ;;  %v583_v47 = vsel %vm524_vm0, %v569_v41, 0.0  ;;  %v2521_v41 = vld [vmem:[%s3688_s3] ss:$0 sm:$0xff] }
  0xa8   : > { %581 = vadd.xlane.f32.xlu0 %v580_v37  ;;  %578 = vadd.xlane.f32.xlu1 %v577_v44  ;;  %v545_v45 = vpop.xlane.xlu0 %544  ;;  %v548_v46 = vpop.xlane.xlu1 %547 }
  0xa9   : > { %v556_v48 = vmul.f32 0.03125, %v545_v45  ;;  %v557_v49 = vmul.f32 0.03125, %v548_v46  ;;  %v570_v50 = vmul.f32 %v3182_v42, %v3182_v42  ;;  %v571_v51 = vmul.f32 %v3185_v43, %v3185_v43 }
  0xab   : > { %v3194_v52 = vsub.f32 %v3151_v16, %v556_v48  ;;  %v3197_v53 = vsub.f32 %v3153_v17, %v557_v49  ;;  %v586_v54 = vsel %vm524_vm0, %v570_v50, 0.0  ;;  %v589_v55 = vsel %vm524_vm0, %v571_v51, 0.0 }
  0xac   : > { %584 = vadd.xlane.f32.xlu1 %v583_v47  ;;  %587 = vadd.xlane.f32.xlu0 %v586_v54 }
  0xad   : > { %v572_v56 = vmul.f32 %v3194_v52, %v3194_v52  ;;  %v573_v57 = vmul.f32 %v3197_v53, %v3197_v53 }
  0xaf   : > { %v592_v58 = vsel %vm524_vm0, %v572_v56, 0.0  ;;  %v595_v59 = vsel %vm524_vm0, %v573_v57, 0.0 }
  0xb0   : > { %590 = vadd.xlane.f32.xlu1 %v589_v55  ;;  %593 = vadd.xlane.f32.xlu0 %v592_v58 }
  0xb4   : > { %596 = vadd.xlane.f32.xlu1 %v595_v59 }
 0x12d   : > { %v576_v62 = vpop.xlane.xlu0 %575 }
 0x12e   : > { %v598_v63 = vmul.f32 0.03125, %v576_v62 }
 0x130   : > { %v606_v0 = vadd.f32 1e-05, %v598_v63 }
 0x131   : > { %v579_v1 = vpop.xlane.xlu1 %578  ;;  %v582_v6 = vpop.xlane.xlu0 %581 }
 0x132   : > { %2887 = vrsqrt.f32 %v606_v0  ;;  %v599_v7 = vmul.f32 0.03125, %v579_v1  ;;  %v600_v8 = vmul.f32 0.03125, %v582_v6 }
 0x134   : > { %v607_v9 = vadd.f32 1e-05, %v599_v7  ;;  %v608_v10 = vadd.f32 1e-05, %v600_v8 }
 0x135   : > { %v585_v13 = vpop.xlane.xlu1 %584  ;;  %v588_v14 = vpop.xlane.xlu0 %587 }
 0x136   : > { %2889 = vrsqrt.f32 %v607_v9  ;;  %v601_v15 = vmul.f32 0.03125, %v585_v13  ;;  %v602_v18 = vmul.f32 0.03125, %v588_v14 }
 0x137   : > { %2891 = vrsqrt.f32 %v608_v10 }
 0x138   : > { %v609_v19 = vadd.f32 1e-05, %v601_v15  ;;  %v610_v20 = vadd.f32 1e-05, %v602_v18 }
 0x139   : > { %v591_v21 = vpop.xlane.xlu1 %590  ;;  %v594_v22 = vpop.xlane.xlu0 %593 }
 0x13a   : > { %2893 = vrsqrt.f32 %v609_v19  ;;  %v603_v23 = vmul.f32 0.03125, %v591_v21  ;;  %v604_v26 = vmul.f32 0.03125, %v594_v22 }
 0x13b   : > { %2895 = vrsqrt.f32 %v610_v20 }
 0x13c   : > { %v611_v27 = vadd.f32 1e-05, %v603_v23  ;;  %v612_v28 = vadd.f32 1e-05, %v604_v26 }
 0x13d   : > { %v597_v29 = vpop.xlane.xlu1 %596 }
 0x13e   : > { %2897 = vrsqrt.f32 %v611_v27  ;;  %v605_v30 = vmul.f32 0.03125, %v597_v29 }
 0x13f   : > { %v2888_v31 = vpop.eup %2887  ;;  %2899 = vrsqrt.f32 %v612_v28 }
 0x140   : > { %v613_v34 = vadd.f32 1e-05, %v605_v30  ;;  %v622_v35 = vmul.f32 %v2888_v31, %v3160_v24 }
 0x142   : > { %2901 = vrsqrt.f32 %v613_v34  ;;  %v636_v40 = vmul.f32 %v2520_v36, %v622_v35 }
 0x143   : > { %v2890_v37 = vpop.eup %2889 }
 0x144   : > { %v2892_v38 = vpop.eup %2891  ;;  %v623_v39 = vmul.f32 %v2890_v37, %v3170_v32  ;;  %v650_v24 = vadd.f32 %v2521_v41, %v636_v40 }
 0x145   : > { %v624_v44 = vmul.f32 %v2892_v38, %v3163_v25  ;;  %v3276_v38 = vld [vmem:[%s3686_s1] sm:$0xff] }
 0x146   : > { %v637_v45 = vmul.f32 %v2520_v36, %v623_v39 }
 0x147   : > { %v2894_v46 = vpop.eup %2893  ;;  %v638_v50 = vmul.f32 %v2520_v36, %v624_v44 }
 0x148   : > { %v2896_v47 = vpop.eup %2895  ;;  %v651_v48 = vadd.f32 %v2521_v41, %v637_v45  ;;  %v625_v49 = vmul.f32 %v2894_v46, %v3173_v33  ;;  %v3282_v45 = vld [vmem:[%s3686_s1 + $0x8] sm:$0xff] }
 0x149   : > { %v626_v51 = vmul.f32 %v2896_v47, %v3182_v42  ;;  %v652_v57 = vadd.f32 %v2521_v41, %v638_v50 }
 0x14a   : > { %v658_v54 = vpack.c.bf16 %v651_v48, %v650_v24  ;;  %v639_v55 = vmul.f32 %v2520_v36, %v625_v49 }
 0x14b   : > { %v2898_v32 = vpop.eup %2897  ;;  %v640_v59 = vmul.f32 %v2520_v36, %v626_v51  ;;  %v3289_v51 = vld [vmem:[%s3686_s1 + $0x10] sm:$0xff] }
 0x14c   : > { %v2900_v56 = vpop.eup %2899  ;;  %2672 = vmatprep.mubr.msk.bf16.mxu1 %vm524_vm0, %v658_v54  ;;  %v653_v58 = vadd.f32 %v2521_v41, %v639_v55  ;;  %v627_v25 = vmul.f32 %v2898_v32, %v3185_v43 }
 0x14d   : > { %v628_v60 = vmul.f32 %v2900_v56, %v3194_v52  ;;  %v654_v33 = vadd.f32 %v2521_v41, %v640_v59  ;;  %v3023_v52 = vmov 0.0  }
 0x14e   : > { %v659_v61 = vpack.c.bf16 %v653_v58, %v652_v57  ;;  %v641_v62 = vmul.f32 %v2520_v36, %v627_v25  ;;  %2680 = vmatprep.subr.bf16.mxu1 %v3023_v52  ;;  %2692 = vmatprep.subr.bf16.mxu0 %v3023_v52 }
 0x14f   : > { %v2902_v63 = vpop.eup %2901  ;;  %v642_v1 = vmul.f32 %v2520_v36, %v628_v60  ;;  %2694 = vmatprep.mubr.msk.bf16.mxu0 %vm3024_vm1, %v3023_v52  ;;  %v3296_v60 = vld [vmem:[%s3686_s1 + $0x28] sm:$0xff] }
 0x150   : > { %2673 = vmatmul.mubr.msk.bf16.vlgmr.msra.gmra.mxu1 %vm524_vm0, %v659_v61  ;;  %v655_v42 = vadd.f32 %v2521_v41, %v641_v62  ;;  %v629_v0 = vmul.f32 %v2902_v63, %v3197_v53  ;;  %v3301_v61 = vld [vmem:[%s3686_s1 + $0x18] sm:$0xff] }
 0x151   : > { %v656_v8 = vadd.f32 %v2521_v41, %v642_v1  ;;  %v3307_v1 = vld [vmem:[%s3686_s1 + $0x20] sm:$0xff] }
 0x152   : > { %v660_v6 = vpack.c.bf16 %v655_v42, %v654_v33  ;;  %v643_v7 = vmul.f32 %v2520_v36, %v629_v0 }
 0x154   : > { %2676 = vmatprep.mubr.msk.bf16.mxu1 %vm524_vm0, %v660_v6  ;;  %v657_v9 = vadd.f32 %v2521_v41, %v643_v7 }
 0x156   : > { %v661_v43 = vpack.c.bf16 %v657_v9, %v656_v8 }
 0x158   : > { %2677 = vmatmul.mubr.msk.bf16.gmra.mxu1 %vm524_vm0, %v661_v43 }
 0x159   : > { %2682 = vmatprep.mubr.msk.bf16.mxu1 %vm3024_vm1, %v3023_v52 }
 0x210   : > { %v2674_v53 = vpop.f32.mrf.mxu1 }
 0x212   : > { %v724_v10 = vpop.f32.mrf.mxu1 }
 0x214   : > { %v2675_v13 = vpop.f32.mrf.mxu1 }
 0x215   : > { %v3237_v14 = vpack.c.bf16 %v2675_v13, %v2674_v53 }
 0x216   : > { %v727_v15 = vpop.f32.mrf.mxu1 }
 0x217   : > { %v3239_v18 = vpack.c.bf16 %v727_v15, %v724_v10  ;;  %819 = vrot.lane.b32.xlu1 %v3237_v14, %s3025_s24  ;;  %v3317_v15 = vld [vmem:[%s3686_s1 + $0x30] sm:$0xff] }
 0x218   : > { %v2678_v19 = vpop.f32.mrf.mxu1 }
 0x219   : > { %768 = vrot.lane.b32.xlu0 %v3239_v18, %s3025_s24 }
 0x21a   : > { %v740_v20 = vpop.f32.mrf.mxu1 }
 0x21c   : > { %v2679_v21 = vpop.f32.mrf.mxu1 }
 0x21d   : > { %v3246_v26 = vpack.c.bf16 %v2679_v21, %v2678_v19 }
 0x21e   : > { %v743_v22 = vpop.f32.mrf.mxu1 }
 0x21f   : > { %v3243_v23 = vpack.c.bf16 %v743_v22, %v740_v20 }
 0x221   : > { %869 = vrot.lane.b32.xlu1 %v3243_v23, %s3025_s24 }
 0x225   : > { %919 = vrot.lane.b32.xlu1 %v3246_v26, %s3025_s24 }
 0x289   : > { %v820_v29 = vpop.permute.xlu1 %819 }
 0x28a   : > { %v825_v31 = vsel %vm770_vm2, %v820_v29, 0  ;;  %v3328_v29 = vld [vmem:[%s3686_s1 + $0x38] sm:$0xff] }
 0x28b   : > { %v769_v27 = vpop.permute.xlu0 %768 }
 0x28c   : > { %v775_v28 = vsel %vm770_vm2, %v769_v27, 0 }
 0x28d   : > { %2681 = vmatpush3.bf16.xpose.msra.mxu1 %v775_v28 }
 0x28e   : > { %2686 = vmatprep.subr.bf16.mxu1 %v3023_v52 }
 0x293   : > { %v870_v30 = vpop.permute.xlu1 %869 }
 0x294   : > { %2683 = vmatmul.mubr.msk.bf16.vlgmr.msra.gmra.mxu1 %vm770_vm2, %v3239_v18  ;;  %v875_v34 = vsel %vm770_vm2, %v870_v30, 0 }
 0x295   : > { %2687 = vmatpush3.bf16.xpose.msra.mxu1 %v825_v31  ;;  %2693 = vmatpush3.bf16.xpose.msra.mxu0 %v875_v34 }
 0x296   : > { %2688 = vmatprep.mubr.msk.bf16.mxu1 %vm3024_vm1, %v3023_v52  ;;  %2698 = vmatprep.subr.bf16.mxu1 %v3023_v52 }
 0x297   : > { %2704 = vmatprep.subr.bf16.mxu0 %v3023_v52  ;;  %v920_v35 = vpop.permute.xlu1 %919 }
 0x298   : > { %v925_v36 = vsel %vm770_vm2, %v920_v35, 0 }
 0x29c   : > { %2689 = vmatmul.mubr.msk.bf16.vlgmr.msra.gmra.mxu1 %vm770_vm2, %v3237_v14  ;;  %2695 = vmatmul.mubr.msk.bf16.vlgmr.msra.gmra.mxu0 %vm770_vm2, %v3243_v23 }
 0x29d   : > { %2699 = vmatpush3.bf16.xpose.msra.mxu1 %v925_v36  ;;  %2700 = vmatprep.mubr.msk.bf16.mxu1 %vm3024_vm1, %v3023_v52 }
 0x29e   : > { %2710 = vmatprep.subr.bf16.mxu1 %v3023_v52  ;;  %2706 = vmatprep.mubr.msk.bf16.mxu0 %vm3024_vm1, %v3023_v52 }
 0x2a4   : > { %2701 = vmatmul.mubr.msk.bf16.vlgmr.msra.gmra.mxu1 %vm770_vm2, %v3246_v26 }
 0x2a5   : > { %2712 = vmatprep.mubr.msk.bf16.mxu1 %vm3024_vm1, %v3023_v52 }
 0x354   : > { %v811_v37 = vpop.f32.mrf.mxu1 }
 0x355   : > { %v968_v39 = vmul.f32 0.35355338, %v811_v37 }
 0x356   : > { %v2684_v40 = vpop.f32.mrf.mxu1 }
 0x357   : > { %v976_v41 = vadd.f32 %v968_v39, %v3276_v38 }
 0x358   : > { %v814_v44 = vpop.f32.mrf.mxu1 }
 0x359   : > { %v969_v46 = vmul.f32 0.35355338, %v814_v44  ;;  %v985_v47 = vsel %vm984_vm3, %v976_v41, -inf }
 0x35a   : > { %986 = vmax.xlane.f32.xlu0 %v985_v47  ;;  %v2685_v24 = vpop.f32.mrf.mxu1 }
 0x35b   : > { %v977_v48 = vadd.f32 %v969_v46, %v3282_v45 }
 0x35c   : > { %v861_v49 = vpop.f32.mrf.mxu1  ;;  %v911_v50 = vpop.f32.mrf.mxu0 }
 0x35d   : > { %v970_v54 = vmul.f32 0.35355338, %v861_v49  ;;  %v988_v55 = vsel %vm984_vm3, %v977_v48, -inf  ;;  %v972_v58 = vmul.f32 0.35355338, %v911_v50 }
 0x35e   : > { %v2696_v32 = vpop.f32.mrf.mxu0  ;;  %989 = vmax.xlane.f32.xlu1 %v988_v55  ;;  %v2690_v56 = vpop.f32.mrf.mxu1 }
 0x35f   : > { %v978_v57 = vadd.f32 %v970_v54, %v3289_v51  ;;  %v980_v10 = vadd.f32 %v972_v58, %v3307_v1 }
 0x360   : > { %v864_v25 = vpop.f32.mrf.mxu1  ;;  %v914_v59 = vpop.f32.mrf.mxu0 }
 0x361   : > { %v971_v62 = vmul.f32 0.35355338, %v864_v25  ;;  %v973_v63 = vmul.f32 0.35355338, %v914_v59  ;;  %v991_v33 = vsel %vm984_vm3, %v978_v57, -inf  ;;  %v997_v20 = vsel %vm984_vm3, %v980_v10, -inf }
 0x362   : > { %v2697_v42 = vpop.f32.mrf.mxu0  ;;  %992 = vmax.xlane.f32.xlu0 %v991_v33  ;;  %v2691_v0 = vpop.f32.mrf.mxu1 }
 0x363   : > { %v981_v6 = vadd.f32 %v973_v63, %v3296_v60  ;;  %v979_v7 = vadd.f32 %v971_v62, %v3301_v61 }
 0x364   : > { %v961_v8 = vpop.f32.mrf.mxu1 }
 0x365   : > { %v974_v9 = vmul.f32 0.35355338, %v961_v8  ;;  %v1000_v43 = vsel %vm984_vm3, %v981_v6, -inf  ;;  %v994_v53 = vsel %vm984_vm3, %v979_v7, -inf }
 0x366   : > { %1001 = vmax.xlane.f32.xlu1 %v1000_v43  ;;  %995 = vmax.xlane.f32.xlu0 %v994_v53  ;;  %v2702_v13 = vpop.f32.mrf.mxu1 }
 0x367   : > { %v982_v21 = vadd.f32 %v974_v9, %v3317_v15 }
 0x368   : > { %v964_v19 = vpop.f32.mrf.mxu1 }
 0x369   : > { %v1003_v27 = vsel %vm984_vm3, %v982_v21, -inf  ;;  %v975_v28 = vmul.f32 0.35355338, %v964_v19 }
 0x36a   : > { %998 = vmax.xlane.f32.xlu0 %v997_v20  ;;  %v2703_v22 = vpop.f32.mrf.mxu1 }
 0x36b   : > { %v3331_v30 = vadd.f32 %v975_v28, %v3328_v29 }
 0x36d   : > { %v1006_v31 = vsel %vm984_vm3, %v3331_v30, -inf }
 0x36e   : > { %1004 = vmax.xlane.f32.xlu0 %v1003_v27 }
 0x377   : > { %1124 = vrot.lane.b32.xlu1 %v3237_v14, %s3026_s15 }
 0x37b   : > { %1171 = vrot.lane.b32.xlu1 %v3243_v23, %s3026_s15 }
 0x384   : > { %1077 = vrot.lane.b32.xlu0 %v3239_v18, %s3026_s15 }
 0x39f   : > { %1007 = vmax.xlane.f32.xlu1 %v1006_v31 }
 0x3b0   : > { %1218 = vrot.lane.b32.xlu1 %v3246_v26, %s3026_s15 }
 0x3e3   : > { %v987_v34 = vpop.xlane.xlu0 %986 }
 0x3e4   : > { %v1009_v35 = vsub.f32 %v976_v41, %v987_v34 }
 0x3e6   : > { %v1017_v36 = vmul.f32 1.442695, %v1009_v35 }
 0x3e7   : > { %v990_v37 = vpop.xlane.xlu1 %989 }
 0x3e8   : > { %2903 = vpow2.f32 %v1017_v36  ;;  %v1010_v39 = vsub.f32 %v977_v48, %v990_v37 }
 0x3ea   : > { %v1019_v40 = vmul.f32 1.442695, %v1010_v39 }
 0x3eb   : > { %v993_v44 = vpop.xlane.xlu0 %992 }
 0x3ec   : > { %2905 = vpow2.f32 %v1019_v40  ;;  %v1011_v46 = vsub.f32 %v978_v57, %v993_v44 }
 0x3ee   : > { %v1021_v47 = vmul.f32 1.442695, %v1011_v46 }
 0x3ef   : > { %v1002_v24 = vpop.xlane.xlu1 %1001  ;;  %v996_v49 = vpop.xlane.xlu0 %995 }
 0x3f0   : > { %2907 = vpow2.f32 %v1021_v47  ;;  %v1014_v50 = vsub.f32 %v981_v6, %v1002_v24  ;;  %v1012_v54 = vsub.f32 %v979_v7, %v996_v49 }
 0x3f2   : > { %v1023_v55 = vmul.f32 1.442695, %v1012_v54  ;;  %v1027_v32 = vmul.f32 1.442695, %v1014_v50 }
 0x3f3   : > { %v1125_v56 = vpop.permute.xlu1 %1124  ;;  %v999_v58 = vpop.xlane.xlu0 %998 }
 0x3f4   : > { %v1013_v25 = vsub.f32 %v980_v10, %v999_v58  ;;  %2711 = vmatpush3.bf16.msra.mxu1 %v1125_v56  ;;  %2909 = vpow2.f32 %v1023_v55 }
 0x3f5   : > { %v3336_v41 = vpop.eup %2903  ;;  %2722 = vmatprep.subr.bf16.mxu1 %v3023_v52  ;;  %2911 = vpow2.f32 %v1027_v32 }
 0x3f6   : > { %v1025_v48 = vmul.f32 1.442695, %v1013_v25  ;;  %v1033_v57 = vsel %vm984_vm3, %v3336_v41, 0.0 }
 0x3f7   : > { %1034 = vadd.xlane.f32.xlu0 %v1033_v57  ;;  %v1005_v59 = vpop.xlane.xlu0 %1004 }
 0x3f8   : > { %2913 = vpow2.f32 %v1025_v48  ;;  %v1015_v62 = vsub.f32 %v982_v21, %v1005_v59  ;;  %v1172_v21 = vpop.permute.xlu1 %1171 }
 0x3f9   : > { %v2906_v63 = vpop.eup %2905 }
 0x3fa   : > { %v1029_v33 = vmul.f32 1.442695, %v1015_v62  ;;  %v1036_v42 = vsel %vm984_vm3, %v2906_v63, 0.0 }
 0x3fb   : > { %v1078_v0 = vpop.permute.xlu0 %1077  ;;  %1037 = vadd.xlane.f32.xlu1 %v1036_v42 }
 0x3fc   : > { %2915 = vpow2.f32 %v1029_v33  ;;  %2705 = vmatpush3.bf16.msra.mxu0 %v1078_v0 }
 0x3fd   : > { %v2908_v6 = vpop.eup %2907  ;;  %2716 = vmatprep.subr.bf16.mxu0 %v3023_v52 }
 0x3fe   : > { %v1039_v7 = vsel %vm984_vm3, %v2908_v6, 0.0 }
 0x3ff   : > { %1040 = vadd.xlane.f32.xlu0 %v1039_v7 }
 0x401   : > { %v2910_v8 = vpop.eup %2909 }
 0x402   : > { %v1042_v9 = vsel %vm984_vm3, %v2910_v8, 0.0  ;;  %v2912_v43 = vpop.eup %2911 }
 0x403   : > { %1043 = vadd.xlane.f32.xlu1 %v1042_v9  ;;  %v1048_v13 = vsel %vm984_vm3, %v2912_v43, 0.0 }
 0x405   : > { %v2914_v53 = vpop.eup %2913 }
 0x406   : > { %v1045_v10 = vsel %vm984_vm3, %v2914_v53, 0.0 }
 0x407   : > { %1046 = vadd.xlane.f32.xlu0 %v1045_v10  ;;  %1049 = vadd.xlane.f32.xlu1 %v1048_v13 }
 0x409   : > { %v3347_v19 = vpop.eup %2915 }
 0x40a   : > { %v1051_v20 = vsel %vm984_vm3, %v3347_v19, 0.0 }
 0x40b   : > { %1052 = vadd.xlane.f32.xlu0 %v1051_v20 }
 0x418   : > { %1318 = vrot.lane.b32.xlu1 %v3237_v14, %s3027_s18 }
 0x421   : > { %1267 = vrot.lane.b32.xlu0 %v3239_v18, %s3027_s18 }
 0x425   : > { %1265 = vrot.lane.b32.xlu0 %v3239_v18, %s3028_s19 }
 0x428   : > { %v1008_v22 = vpop.xlane.xlu1 %1007 }
 0x429   : > { %v1016_v27 = vsub.f32 %v3331_v30, %v1008_v22  ;;  %1316 = vrot.lane.b32.xlu0 %v3237_v14, %s3028_s19 }
 0x42b   : > { %v1031_v28 = vmul.f32 1.442695, %v1016_v27 }
 0x42c   : > { %v1219_v35 = vpop.permute.xlu1 %1218 }
 0x42d   : > { %2917 = vpow2.f32 %v1031_v28  ;;  %1367 = vrot.lane.b32.xlu0 %v3243_v23, %s3028_s19 }
 0x43a   : > { %v3357_v31 = vpop.eup %2917 }
 0x43b   : > { %v1054_v34 = vsel %vm984_vm3, %v3357_v31, 0.0 }
 0x43c   : > { %1055 = vadd.xlane.f32.xlu1 %v1054_v34 }
 0x44d   : > { %1369 = vrot.lane.b32.xlu1 %v3243_v23, %s3027_s18 }
 0x451   : > { %1420 = vrot.lane.b32.xlu1 %v3246_v26, %s3027_s18 }
 0x455   : > { %1418 = vrot.lane.b32.xlu1 %v3246_v26, %s3028_s19 }
 0x480   : > { %v1035_v30 = vpop.xlane.xlu0 %1034 }
 0x481   : > { %2919 = vrcp.f32 %v1035_v30 }
 0x484   : > { %v1038_v36 = vpop.xlane.xlu1 %1037 }
 0x485   : > { %2921 = vrcp.f32 %v1038_v36 }
 0x488   : > { %v1041_v37 = vpop.xlane.xlu0 %1040 }
 0x489   : > { %2923 = vrcp.f32 %v1041_v37 }
 0x48c   : > { %v1044_v39 = vpop.xlane.xlu1 %1043 }
 0x48d   : > { %2925 = vrcp.f32 %v1044_v39 }
 0x48e   : > { %v2920_v40 = vpop.eup %2919 }
 0x48f   : > { %v1065_v24 = vmul.f32 %v2920_v40, %v3336_v41 }
 0x490   : > { %v1047_v44 = vpop.xlane.xlu0 %1046  ;;  %v1050_v46 = vpop.xlane.xlu1 %1049 }
 0x491   : > { %2927 = vrcp.f32 %v1047_v44 }
 0x492   : > { %v2922_v47 = vpop.eup %2921  ;;  %2929 = vrcp.f32 %v1050_v46 }
 0x493   : > { %v1066_v49 = vmul.f32 %v2922_v47, %v2906_v63 }
 0x494   : > { %v1053_v32 = vpop.xlane.xlu0 %1052  ;;  %v1319_v0 = vpop.permute.xlu1 %1318 }
 0x495   : > { %v1073_v50 = vpack.c.bf16 %v1066_v49, %v1065_v24  ;;  %2931 = vrcp.f32 %v1053_v32  ;;  %v1324_v22 = vsel %vm770_vm2, %v1319_v0, 0 }
 0x496   : > { %v2924_v54 = vpop.eup %2923 }
 0x497   : > { %2707 = vmatmul.mubr.msk.bf16.vlgmr.msra.gmra.mxu0 %vm984_vm3, %v1073_v50  ;;  %v1067_v56 = vmul.f32 %v2924_v54, %v2908_v6 }
 0x498   : > { %2717 = vmatpush3.bf16.msra.mxu0 %v1172_v21  ;;  %2718 = vmatprep.mubr.msk.bf16.mxu0 %vm3024_vm1, %v3023_v52  ;;  %v1268_v62 = vpop.permute.xlu0 %1267 }
 0x499   : > { %2728 = vmatprep.subr.bf16.mxu0 %v3023_v52  ;;  %v1273_v33 = vsel %vm770_vm2, %v1268_v62, 0 }
 0x49a   : > { %v2926_v55 = vpop.eup %2925 }
 0x49b   : > { %v1068_v58 = vmul.f32 %v2926_v55, %v2910_v8 }
 0x49c   : > { %v1266_v42 = vpop.permute.xlu0 %1265 }
 0x49d   : > { %v1074_v48 = vpack.c.bf16 %v1068_v58, %v1067_v56 }
 0x49e   : > { %v2928_v25 = vpop.eup %2927 }
 0x49f   : > { %v2930_v57 = vpop.eup %2929  ;;  %v1069_v59 = vmul.f32 %v2928_v25, %v2914_v53  ;;  %2713 = vmatmul.mubr.msk.bf16.vlgmr.msra.gmra.mxu1 %vm984_vm3, %v1074_v48 }
 0x4a0   : > { %v1070_v41 = vmul.f32 %v2930_v57, %v2912_v43  ;;  %2723 = vmatpush3.bf16.msra.mxu1 %v1219_v35  ;;  %2724 = vmatprep.mubr.msk.bf16.mxu1 %vm3024_vm1, %v3023_v52  ;;  %v1317_v9 = vpop.permute.xlu0 %1316 }
 0x4a1   : > { %2734 = vmatprep.subr.bf16.mxu1 %v3023_v52 }
 0x4a2   : > { %v1075_v63 = vpack.c.bf16 %v1070_v41, %v1069_v59  ;;  %v2932_v43 = vpop.eup %2931 }
 0x4a3   : > { %v1071_v13 = vmul.f32 %v2932_v43, %v3347_v19 }
 0x4a4   : > { %2719 = vmatmul.mubr.msk.bf16.vlgmr.msra.gmra.mxu0 %vm984_vm3, %v1075_v63  ;;  %v1368_v53 = vpop.permute.xlu0 %1367 }
 0x4a5   : > { %2729 = vmatpush3.bf16.xpose.msra.mxu0 %v1273_v33  ;;  %2730 = vmatprep.mubr.msk.bf16.mxu0 %vm3024_vm1, %v3023_v52 }
 0x4a6   : > { %2740 = vmatprep.subr.bf16.mxu0 %v3023_v52 }
 0x4ac   : > { %2731 = vmatmul.mubr.msk.bf16.vlgmr.msra.gmra.mxu0 %vm770_vm2, %v1266_v42 }
 0x4ad   : > { %2742 = vmatprep.mubr.msk.bf16.mxu0 %vm3024_vm1, %v3023_v52 }
 0x4c5   : > { %v1056_v6 = vpop.xlane.xlu1 %1055 }
 0x4c6   : > { %2933 = vrcp.f32 %v1056_v6 }
 0x4c9   : > { %v1370_v7 = vpop.permute.xlu1 %1369 }
 0x4ca   : > { %v1375_v8 = vsel %vm770_vm2, %v1370_v7, 0 }
 0x4cb   : > { %2741 = vmatpush3.bf16.xpose.msra.mxu0 %v1375_v8 }
 0x4cc   : > { %2752 = vmatprep.subr.bf16.mxu0 %v3023_v52 }
 0x4cd   : > { %v1421_v27 = vpop.permute.xlu1 %1420 }
 0x4ce   : > { %v1426_v28 = vsel %vm770_vm2, %v1421_v27, 0 }
 0x4d1   : > { %v1419_v19 = vpop.permute.xlu1 %1418 }
 0x4d2   : > { %2743 = vmatmul.mubr.msk.bf16.vlgmr.msra.gmra.mxu0 %vm770_vm2, %v1368_v53 }
 0x4d3   : > { %v2934_v10 = vpop.eup %2933  ;;  %2754 = vmatprep.mubr.msk.bf16.mxu0 %vm3024_vm1, %v3023_v52 }
 0x4d4   : > { %v1072_v20 = vmul.f32 %v2934_v10, %v3357_v31 }
 0x4d6   : > { %v1076_v21 = vpack.c.bf16 %v1072_v20, %v1071_v13 }
 0x4d8   : > { %2725 = vmatmul.mubr.msk.bf16.vlgmr.msra.gmra.mxu1 %vm984_vm3, %v1076_v21 }
 0x4d9   : > { %2735 = vmatpush3.bf16.xpose.msra.mxu1 %v1324_v22  ;;  %2736 = vmatprep.mubr.msk.bf16.mxu1 %vm3024_vm1, %v3023_v52 }
 0x4da   : > { %2746 = vmatprep.subr.bf16.mxu1 %v3023_v52 }
 0x4e0   : > { %2737 = vmatmul.mubr.msk.bf16.vlgmr.msra.gmra.mxu1 %vm770_vm2, %v1317_v9 }
 0x4e1   : > { %2747 = vmatpush3.bf16.xpose.msra.mxu1 %v1426_v28  ;;  %2748 = vmatprep.mubr.msk.bf16.mxu1 %vm3024_vm1, %v3023_v52 }
 0x4e2   : > { %2758 = vmatprep.subr.bf16.mxu1 %v3023_v52 }
 0x4e8   : > { %2749 = vmatmul.mubr.msk.bf16.vlgmr.msra.gmra.mxu1 %vm770_vm2, %v1419_v19 }
 0x4e9   : > { %2760 = vmatprep.mubr.msk.bf16.mxu1 %vm3024_vm1, %v3023_v52 }
 0x557   : > { %v3401_v31 = vpop.f32.mrf.mxu0 }
 0x559   : > { %v2708_v34 = vpop.f32.mrf.mxu0 }
 0x55b   : > { %v3403_v35 = vpop.f32.mrf.mxu0 }
 0x55d   : > { %v2709_v30 = vpop.f32.mrf.mxu0 }
 0x55f   : > { %v3405_v36 = vpop.f32.mrf.mxu1 }
 0x561   : > { %v2714_v37 = vpop.f32.mrf.mxu1 }
 0x563   : > { %v3407_v39 = vpop.f32.mrf.mxu1 }
 0x564   : > { %v3409_v40 = vpop.f32.mrf.mxu0 }
 0x565   : > { %v2715_v44 = vpop.f32.mrf.mxu1 }
 0x566   : > { %v2720_v46 = vpop.f32.mrf.mxu0 }
 0x568   : > { %v3411_v47 = vpop.f32.mrf.mxu0 }
 0x56a   : > { %v2721_v24 = vpop.f32.mrf.mxu0 }
 0x56c   : > { %v1309_v49 = vpop.f32.mrf.mxu0 }
 0x56d   : > { %v1469_v50 = vmul.f32 0.35355338, %v1309_v49 }
 0x56e   : > { %v2732_v54 = vpop.f32.mrf.mxu0 }
 0x56f   : > { %v1477_v55 = vadd.f32 %v1469_v50, %v3276_v38 }
 0x570   : > { %v1312_v32 = vpop.f32.mrf.mxu0 }
 0x571   : > { %v1470_v56 = vmul.f32 0.35355338, %v1312_v32  ;;  %v1485_v58 = vsel %vm984_vm3, %v1477_v55, -inf }
 0x572   : > { %1486 = vmax.xlane.f32.xlu0 %v1485_v58  ;;  %v2733_v25 = vpop.f32.mrf.mxu0 }
 0x573   : > { %v1478_v48 = vadd.f32 %v1470_v56, %v3282_v45 }
 0x575   : > { %v1488_v57 = vsel %vm984_vm3, %v1478_v48, -inf }
 0x576   : > { %1489 = vmax.xlane.f32.xlu1 %v1488_v57 }
 0x592   : > { %v1411_v59 = vpop.f32.mrf.mxu0 }
 0x593   : > { %v1473_v13 = vmul.f32 0.35355338, %v1411_v59 }
 0x594   : > { %v2744_v41 = vpop.f32.mrf.mxu0 }
 0x595   : > { %v1481_v34 = vadd.f32 %v1473_v13, %v3307_v1 }
 0x596   : > { %v1414_v62 = vpop.f32.mrf.mxu0 }
 0x597   : > { %v1474_v63 = vmul.f32 0.35355338, %v1414_v62 }
 0x598   : > { %v3417_v33 = vpop.f32.mrf.mxu1  ;;  %v2745_v42 = vpop.f32.mrf.mxu0 }
 0x599   : > { %v1482_v38 = vadd.f32 %v1474_v63, %v3296_v60 }
 0x59a   : > { %v2726_v0 = vpop.f32.mrf.mxu1 }
 0x59b   : > { %v1500_v6 = vsel %vm984_vm3, %v1482_v38, -inf }
 0x59c   : > { %1501 = vmax.xlane.f32.xlu1 %v1500_v6  ;;  %v3421_v7 = vpop.f32.mrf.mxu1 }
 0x59e   : > { %v2727_v8 = vpop.f32.mrf.mxu1 }
 0x5a0   : > { %v1360_v45 = vpop.f32.mrf.mxu1 }
 0x5a1   : > { %v1471_v9 = vmul.f32 0.35355338, %v1360_v45 }
 0x5a2   : > { %v2738_v43 = vpop.f32.mrf.mxu1 }
 0x5a3   : > { %v1479_v53 = vadd.f32 %v1471_v9, %v3289_v51  ;;  %v1497_v51 = vsel %vm984_vm3, %v1481_v34, -inf }
 0x5a4   : > { %v1363_v10 = vpop.f32.mrf.mxu1 }
 0x5a5   : > { %v1472_v20 = vmul.f32 0.35355338, %v1363_v10  ;;  %v1491_v21 = vsel %vm984_vm3, %v1479_v53, -inf }
 0x5a6   : > { %1492 = vmax.xlane.f32.xlu0 %v1491_v21  ;;  %v2739_v22 = vpop.f32.mrf.mxu1 }
 0x5a7   : > { %v1480_v60 = vadd.f32 %v1472_v20, %v3301_v61 }
 0x5a8   : > { %v1462_v27 = vpop.f32.mrf.mxu1 }
 0x5a9   : > { %v1475_v28 = vmul.f32 0.35355338, %v1462_v27  ;;  %v1494_v19 = vsel %vm984_vm3, %v1480_v60, -inf }
 0x5aa   : > { %1495 = vmax.xlane.f32.xlu0 %v1494_v19  ;;  %v2750_v30 = vpop.f32.mrf.mxu1 }
 0x5ab   : > { %v1483_v46 = vadd.f32 %v1475_v28, %v3317_v15 }
 0x5ac   : > { %v1465_v37 = vpop.f32.mrf.mxu1 }
 0x5ad   : > { %v1476_v44 = vmul.f32 0.35355338, %v1465_v37  ;;  %v1503_v61 = vsel %vm984_vm3, %v1483_v46, -inf }
 0x5ae   : > { %1498 = vmax.xlane.f32.xlu0 %v1497_v51  ;;  %v2751_v24 = vpop.f32.mrf.mxu1 }
 0x5af   : > { %v1484_v49 = vadd.f32 %v1476_v44, %v3328_v29 }
 0x5b1   : > { %v1506_v50 = vsel %vm984_vm3, %v1484_v49, -inf }
 0x5b2   : > { %1504 = vmax.xlane.f32.xlu0 %v1503_v61  ;;  %1507 = vmax.xlane.f32.xlu1 %v1506_v50 }
 0x5fb   : > { %v1487_v54 = vpop.xlane.xlu0 %1486 }
 0x5fc   : > { %v1509_v1 = vsub.f32 %v1477_v55, %v1487_v54 }
 0x5fe   : > { %v1517_v32 = vmul.f32 1.442695, %v1509_v1 }
 0x5ff   : > { %v1490_v56 = vpop.xlane.xlu1 %1489 }
 0x600   : > { %2935 = vpow2.f32 %v1517_v32  ;;  %v1510_v58 = vsub.f32 %v1478_v48, %v1490_v56 }
 0x602   : > { %v1519_v25 = vmul.f32 1.442695, %v1510_v58 }
 0x604   : > { %2937 = vpow2.f32 %v1519_v25 }
 0x60d   : > { %v3433_v57 = vpop.eup %2935 }
 0x60e   : > { %v1533_v15 = vsel %vm984_vm3, %v3433_v57, 0.0 }
 0x60f   : > { %1534 = vadd.xlane.f32.xlu0 %v1533_v15 }
 0x611   : > { %v3437_v29 = vpop.eup %2937 }
 0x612   : > { %v1536_v59 = vsel %vm984_vm3, %v3437_v29, 0.0 }
 0x613   : > { %1537 = vadd.xlane.f32.xlu1 %v1536_v59 }
 0x625   : > { %v1502_v41 = vpop.xlane.xlu1 %1501 }
 0x626   : > { %v1514_v63 = vsub.f32 %v1482_v38, %v1502_v41 }
 0x628   : > { %v1527_v6 = vmul.f32 1.442695, %v1514_v63 }
 0x62f   : > { %v1493_v55 = vpop.xlane.xlu0 %1492 }
 0x630   : > { %v1511_v62 = vsub.f32 %v1479_v53, %v1493_v55 }
 0x632   : > { %v1521_v42 = vmul.f32 1.442695, %v1511_v62 }
 0x633   : > { %v1496_v48 = vpop.xlane.xlu0 %1495 }
 0x634   : > { %2939 = vpow2.f32 %v1521_v42  ;;  %v1512_v0 = vsub.f32 %v1480_v60, %v1496_v48 }
 0x636   : > { %v1523_v8 = vmul.f32 1.442695, %v1512_v0 }
 0x637   : > { %v1499_v45 = vpop.xlane.xlu0 %1498 }
 0x638   : > { %2941 = vpow2.f32 %v1523_v8  ;;  %v1513_v9 = vsub.f32 %v1481_v34, %v1499_v45 }
 0x639   : > { %2943 = vpow2.f32 %v1527_v6 }
 0x63a   : > { %v1525_v43 = vmul.f32 1.442695, %v1513_v9 }
 0x63b   : > { %v1505_v10 = vpop.xlane.xlu0 %1504  ;;  %v1508_v37 = vpop.xlane.xlu1 %1507 }
 0x63c   : > { %2945 = vpow2.f32 %v1525_v43  ;;  %v1515_v13 = vsub.f32 %v1483_v46, %v1505_v10  ;;  %v1516_v44 = vsub.f32 %v1484_v49, %v1508_v37 }
 0x63e   : > { %v1529_v20 = vmul.f32 1.442695, %v1515_v13  ;;  %v1531_v51 = vmul.f32 1.442695, %v1516_v44 }
 0x640   : > { %2947 = vpow2.f32 %v1529_v20 }
 0x641   : > { %v2940_v21 = vpop.eup %2939  ;;  %2949 = vpow2.f32 %v1531_v51 }
 0x642   : > { %v1539_v53 = vsel %vm984_vm3, %v2940_v21, 0.0 }
 0x643   : > { %1540 = vadd.xlane.f32.xlu0 %v1539_v53 }
 0x645   : > { %v2942_v38 = vpop.eup %2941 }
 0x646   : > { %v1542_v22 = vsel %vm984_vm3, %v2942_v38, 0.0  ;;  %v2944_v60 = vpop.eup %2943 }
 0x647   : > { %1543 = vadd.xlane.f32.xlu1 %v1542_v22  ;;  %v1548_v19 = vsel %vm984_vm3, %v2944_v60, 0.0 }
 0x649   : > { %v2946_v27 = vpop.eup %2945 }
 0x64a   : > { %v1545_v28 = vsel %vm984_vm3, %v2946_v27, 0.0 }
 0x64b   : > { %1546 = vadd.xlane.f32.xlu0 %v1545_v28  ;;  %1549 = vadd.xlane.f32.xlu1 %v1548_v19 }
 0x64d   : > { %v3445_v34 = vpop.eup %2947 }
 0x64e   : > { %v1551_v30 = vsel %vm984_vm3, %v3445_v34, 0.0  ;;  %v2950_v46 = vpop.eup %2949 }
 0x64f   : > { %1552 = vadd.xlane.f32.xlu0 %v1551_v30  ;;  %v1554_v24 = vsel %vm984_vm3, %v2950_v46, 0.0 }
 0x65c   : > { %1624 = vrot.lane.b32.xlu1 %v3237_v14, %s3029_s20 }
 0x660   : > { %1671 = vrot.lane.b32.xlu1 %v3243_v23, %s3029_s20 }
 0x665   : > { %1577 = vrot.lane.b32.xlu0 %v3239_v18, %s3029_s20 }
 0x684   : > { %1555 = vadd.xlane.f32.xlu1 %v1554_v24 }
 0x695   : > { %1718 = vrot.lane.b32.xlu1 %v3246_v26, %s3029_s20  ;;  %s3651_s20 = scalar_lea.vmem %s3698_s13, %s2578_s29 }
 0x698   : > { %v1535_v50 = vpop.xlane.xlu0 %1534 }
 0x69c   : > { %v1538_v61 = vpop.xlane.xlu1 %1537 }
 0x69d   : > { %2951 = vrcp.f32 %v1538_v61 }
 0x69e   : > { %2953 = vrcp.f32 %v1535_v50 }
 0x6aa   : > { %v2952_v49 = vpop.eup %2951 }
 0x6ab   : > { %v2954_v56 = vpop.eup %2953  ;;  %v1566_v58 = vmul.f32 %v2952_v49, %v3437_v29 }
 0x6ac   : > { %v1565_v15 = vmul.f32 %v2954_v56, %v3433_v57 }
 0x6ae   : > { %v1573_v41 = vpack.c.bf16 %v1566_v58, %v1565_v15 }
 0x6cc   : > { %v1541_v54 = vpop.xlane.xlu0 %1540 }
 0x6cd   : > { %2955 = vrcp.f32 %v1541_v54 }
 0x6d0   : > { %v1544_v14 = vpop.xlane.xlu1 %1543 }
 0x6d1   : > { %2957 = vrcp.f32 %v1544_v14 }
 0x6d4   : > { %v1547_v23 = vpop.xlane.xlu0 %1546  ;;  %v1550_v18 = vpop.xlane.xlu1 %1549 }
 0x6d5   : > { %2959 = vrcp.f32 %v1547_v23 }
 0x6d6   : > { %2961 = vrcp.f32 %v1550_v18 }
 0x6d8   : > { %v1553_v1 = vpop.xlane.xlu0 %1552  ;;  %v1625_v32 = vpop.permute.xlu1 %1624 }
 0x6d9   : > { %2759 = vmatpush3.bf16.msra.mxu1 %v1625_v32  ;;  %2963 = vrcp.f32 %v1553_v1 }
 0x6da   : > { %2770 = vmatprep.subr.bf16.mxu1 %v3023_v52  ;;  %v2956_v26 = vpop.eup %2955 }
 0x6db   : > { %v1567_v55 = vmul.f32 %v2956_v26, %v2940_v21 }
 0x6dc   : > { %v1578_v25 = vpop.permute.xlu0 %1577  ;;  %v1672_v63 = vpop.permute.xlu1 %1671 }
 0x6dd   : > { %2753 = vmatpush3.bf16.msra.mxu0 %v1578_v25 }
 0x6de   : > { %v2958_v59 = vpop.eup %2957  ;;  %2764 = vmatprep.subr.bf16.mxu0 %v3023_v52 }
 0x6df   : > { %v1568_v62 = vmul.f32 %v2958_v59, %v2942_v38 }
 0x6e0   : > { %2755 = vmatmul.mubr.msk.bf16.vlgmr.msra.gmra.mxu0 %vm984_vm3, %v1573_v41 }
 0x6e1   : > { %2765 = vmatpush3.bf16.msra.mxu0 %v1672_v63  ;;  %v1574_v42 = vpack.c.bf16 %v1568_v62, %v1567_v55  ;;  %2766 = vmatprep.mubr.msk.bf16.mxu0 %vm3024_vm1, %v3023_v52 }
 0x6e2   : > { %v2960_v29 = vpop.eup %2959 }
 0x6e3   : > { %v2962_v48 = vpop.eup %2961  ;;  %2761 = vmatmul.mubr.msk.bf16.vlgmr.msra.gmra.mxu1 %vm984_vm3, %v1574_v42  ;;  %v1569_v57 = vmul.f32 %v2960_v29, %v2946_v27 }
 0x6e4   : > { %v1570_v0 = vmul.f32 %v2962_v48, %v2944_v60  ;;  %2772 = vmatprep.mubr.msk.bf16.mxu1 %vm3024_vm1, %v3023_v52  ;;  %v2876_v52 = vld [vmem:[%s3690_s5] sm:$0xff]  }
 0x6e5   : > { %2776 = vmatprep.subr.bf16.mxu0 %v2876_v52 }
 0x6e6   : > { %v1575_v6 = vpack.c.bf16 %v1570_v0, %v1569_v57  ;;  %v2964_v9 = vpop.eup %2963 }
 0x6e7   : > { %v1571_v10 = vmul.f32 %v2964_v9, %v3445_v34 }
 0x6e8   : > { %2767 = vmatmul.mubr.msk.bf16.vlgmr.msra.gmra.mxu0 %vm984_vm3, %v1575_v6 }
 0x6e9   : > { %2777 = vmatpush3.bf16.msra.mxu0 %v2876_v52 }
 0x70d   : > { %v1556_v8 = vpop.xlane.xlu1 %1555 }
 0x70e   : > { %2965 = vrcp.f32 %v1556_v8 }
 0x711   : > { %v1719_v45 = vpop.permute.xlu1 %1718 }
 0x712   : > { %2771 = vmatpush3.bf16.msra.mxu1 %v1719_v45 }
 0x71b   : > { %v2966_v43 = vpop.eup %2965 }
 0x71c   : > { %v1572_v13 = vmul.f32 %v2966_v43, %v2950_v46 }
 0x71e   : > { %v1576_v20 = vpack.c.bf16 %v1572_v13, %v1571_v10 }
 0x720   : > { %2773 = vmatmul.mubr.msk.bf16.vlgmr.msra.gmra.mxu1 %vm984_vm3, %v1576_v20 }
 0x7a0   : > { %v1617_v21 = vpop.f32.mrf.mxu0 }
 0x7a2   : > { %v2756_v53 = vpop.f32.mrf.mxu0 }
 0x7a3   : > { %v1664_v38 = vpop.f32.mrf.mxu1 }
 0x7a4   : > { %v1620_v22 = vpop.f32.mrf.mxu0 }
 0x7a5   : > { %v2854_v60 = vpack.i.bf16 %v1620_v22, %v1617_v21  ;;  %v2762_v27 = vpop.f32.mrf.mxu1 }
 0x7a6   : > { %v2757_v28 = vpop.f32.mrf.mxu0 }
 0x7a7   : > { %2855 = vrot.lane.b32.xlu0 %v2854_v60, %s3030_s23  ;;  %v1667_v19 = vpop.f32.mrf.mxu1 }
 0x7a8   : > { %v2859_v34 = vpack.i.bf16 %v1667_v19, %v1664_v38  ;;  %v1711_v30 = vpop.f32.mrf.mxu0 }
 0x7a9   : > { %v2763_v37 = vpop.f32.mrf.mxu1 }
 0x7aa   : > { %v2768_v44 = vpop.f32.mrf.mxu0  ;;  %2860 = vrot.lane.b32.xlu1 %v2859_v34, %s3030_s23 }
 0x7ac   : > { %v1714_v51 = vpop.f32.mrf.mxu0 }
 0x7ad   : > { %v2864_v46 = vpack.i.bf16 %v1714_v51, %v1711_v30 }
 0x7ae   : > { %v2769_v24 = vpop.f32.mrf.mxu0 }
 0x7af   : > { %2865 = vrot.lane.b32.xlu0 %v2864_v46, %s3030_s23 }
 0x7e0   : > { %v1758_v61 = vpop.f32.mrf.mxu1 }
 0x7e2   : > { %v2774_v50 = vpop.f32.mrf.mxu1 }
 0x7e4   : > { %v1761_v54 = vpop.f32.mrf.mxu1 }
 0x7e5   : > { %v2869_v14 = vpack.i.bf16 %v1761_v54, %v1758_v61 }
 0x7e6   : > { %v2775_v23 = vpop.f32.mrf.mxu1 }
 0x7e7   : > { %2870 = vrot.lane.b32.xlu1 %v2869_v14, %s3030_s23 }
 0x819   : > { %v2856_v18 = vpop.permute.xlu0 %2855 }
 0x81a   : > { %v2858_v49 = vunpack.i.h.bf16 %v2856_v18  ;;  %v2857_v1 = vunpack.i.l.bf16 %v2856_v18 }
 0x81c   : > { %v1798_v32 = vsel %vm770_vm2, %v3403_v35, %v2858_v49  ;;  %v1797_v56 = vsel %vm770_vm2, %v3401_v31, %v2857_v1  ;;  %v2861_v58 = vpop.permute.xlu1 %2860 }
 0x81d   : > { %v1805_v26 = vpack.c.bf16 %v1798_v32, %v1797_v56  ;;  %v2863_v25 = vunpack.i.h.bf16 %v2861_v58  ;;  %v2862_v15 = vunpack.i.l.bf16 %v2861_v58 }
 0x81f   : > { %v1800_v59 = vsel %vm770_vm2, %v3407_v39, %v2863_v25  ;;  %v1799_v41 = vsel %vm770_vm2, %v3405_v36, %v2862_v15  ;;  %2778 = vmatprep.mubr.msk.bf16.mxu0 %vm984_vm3, %v1805_v26 }
 0x820   : > { %v1806_v55 = vpack.c.bf16 %v1800_v59, %v1799_v41 }
 0x821   : > { %v2866_v62 = vpop.permute.xlu0 %2865 }
 0x822   : > { %v2868_v63 = vunpack.i.h.bf16 %v2866_v62  ;;  %v2867_v42 = vunpack.i.l.bf16 %v2866_v62  ;;  %2779 = vmatmul.mubr.msk.bf16.vlgmr.msra.gmra.mxu0 %vm984_vm3, %v1806_v55 }
 0x824   : > { %v1802_v31 = vsel %vm770_vm2, %v3411_v47, %v2868_v63  ;;  %v1801_v35 = vsel %vm770_vm2, %v3409_v40, %v2867_v42  ;;  %v2544_v40 = vld [vmem:[%s3691_s6] ss:$0 sm:$0xff]  ;;  %v2877_v63 = vld [vmem:[%s3694_s9 + $0x8] sm:$0xff]  }
 0x825   : > { %v1807_v29 = vpack.c.bf16 %v1802_v31, %v1801_v35  ;;  %v2878_v42 = vld [vmem:[%s3694_s9] sm:$0xff]   ;;  %2786 = vmatprep.subr.bf16.mxu1 %v2877_v63 }
 0x826   : > { %2787 = vmatpush3.bf16.msra.mxu1 %v2877_v63 }
 0x827   : > { %2782 = vmatprep.mubr.msk.bf16.mxu0 %vm984_vm3, %v1807_v29  ;;  %2788 = vmatprep.subr.bf16.mxu1 %v2878_v42 }
 0x82a   : > { %2789 = vmatpush3.bf16.msra.mxu1 %v2878_v42 }
 0x859   : > { %v2871_v39 = vpop.permute.xlu1 %2870 }
 0x85a   : > { %v2873_v48 = vunpack.i.h.bf16 %v2871_v39  ;;  %v2872_v36 = vunpack.i.l.bf16 %v2871_v39 }
 0x85c   : > { %v1804_v57 = vsel %vm770_vm2, %v3421_v7, %v2873_v48  ;;  %v1803_v0 = vsel %vm770_vm2, %v3417_v33, %v2872_v36 }
 0x85d   : > { %v1808_v6 = vpack.c.bf16 %v1804_v57, %v1803_v0 }
 0x85f   : > { %2783 = vmatmul.mubr.msk.bf16.gmra.mxu0 %vm984_vm3, %v1808_v6 }
 0x8e2   : > { %v2780_v8 = vpop.f32.mrf.mxu0 }
 0x8e3   : > { %v1879_v45 = vadd.f32 %v2780_v8, %v2544_v40 }
 0x8e4   : > { %v1870_v47 = vpop.f32.mrf.mxu0 }
 0x8e5   : > { %v1871_v9 = vadd.f32 %v2544_v40, %v1870_v47  ;;  %v3497_v7 = vadd.f32 %v3129_v3, %v1879_v45 }
 0x8e6   : > { %v2781_v43 = vpop.f32.mrf.mxu0 }
 0x8e7   : > { %v3494_v10 = vadd.f32 %v3127_v2, %v1871_v9  ;;  %v1882_v33 = vadd.f32 %v2781_v43, %v2544_v40  ;;  %v1917_v2 = vsel %vm524_vm0, %v3497_v7, 0.0 }
 0x8e8   : > { %v1873_v13 = vpop.f32.mrf.mxu0 }
 0x8e9   : > { %v1874_v20 = vadd.f32 %v2544_v40, %v1873_v13  ;;  %v1911_v52 = vsel %vm524_vm0, %v3494_v10, 0.0  ;;  %v3505_v53 = vadd.f32 %v3133_v5, %v1882_v33 }
 0x8ea   : > { %1912 = vadd.xlane.f32.xlu0 %v1911_v52 }
 0x8eb   : > { %v3502_v21 = vadd.f32 %v3131_v4, %v1874_v20  ;;  %v1920_v3 = vsel %vm524_vm0, %v3505_v53, 0.0 }
 0x8ed   : > { %v1914_v38 = vsel %vm524_vm0, %v3502_v21, 0.0 }
 0x8ee   : > { %1918 = vadd.xlane.f32.xlu0 %v1917_v2  ;;  %1915 = vadd.xlane.f32.xlu1 %v1914_v38 }
 0x8f2   : > { %1921 = vadd.xlane.f32.xlu0 %v1920_v3 }
 0x91f   : > { %v2784_v22 = vpop.f32.mrf.mxu0 }
 0x920   : > { %v1895_v27 = vadd.f32 %v2784_v22, %v2544_v40 }
 0x921   : > { %v1886_v60 = vpop.f32.mrf.mxu0 }
 0x922   : > { %v1887_v4 = vadd.f32 %v2544_v40, %v1886_v60  ;;  %v3517_v34 = vadd.f32 %v3151_v16, %v1895_v27 }
 0x923   : > { %v2785_v28 = vpop.f32.mrf.mxu0 }
 0x924   : > { %v3514_v5 = vadd.f32 %v3143_v11, %v1887_v4  ;;  %v1898_v30 = vadd.f32 %v2785_v28, %v2544_v40  ;;  %v1929_v24 = vsel %vm524_vm0, %v3517_v34, 0.0 }
 0x925   : > { %v1889_v19 = vpop.f32.mrf.mxu0 }
 0x926   : > { %v1890_v37 = vadd.f32 %v2544_v40, %v1889_v19  ;;  %v1923_v44 = vsel %vm524_vm0, %v3514_v5, 0.0  ;;  %v3525_v46 = vadd.f32 %v3153_v17, %v1898_v30 }
 0x927   : > { %1924 = vadd.xlane.f32.xlu0 %v1923_v44 }
 0x928   : > { %v3522_v51 = vadd.f32 %v3145_v12, %v1890_v37  ;;  %v1932_v16 = vsel %vm524_vm0, %v3525_v46, 0.0 }
 0x92a   : > { %v1926_v11 = vsel %vm524_vm0, %v3522_v51, 0.0 }
 0x92b   : > { %1927 = vadd.xlane.f32.xlu1 %v1926_v11  ;;  %1930 = vadd.xlane.f32.xlu0 %v1929_v24 }
 0x92f   : > { %1933 = vadd.xlane.f32.xlu1 %v1932_v16 }
 0x973   : > { %v1913_v61 = vpop.xlane.xlu0 %1912 }
 0x974   : > { %v1935_v50 = vmul.f32 0.03125, %v1913_v61  ;;  %v2550_v61 = vld [vmem:[%s3692_s7] ss:$0 sm:$0xff] }
 0x976   : > { %v3534_v12 = vsub.f32 %v3494_v10, %v1935_v50 }
 0x977   : > { %v1919_v54 = vpop.xlane.xlu0 %1918  ;;  %v1916_v17 = vpop.xlane.xlu1 %1915 }
 0x978   : > { %v1937_v14 = vmul.f32 0.03125, %v1919_v54  ;;  %v1936_v23 = vmul.f32 0.03125, %v1916_v17  ;;  %v1951_v18 = vmul.f32 %v3534_v12, %v3534_v12 }
 0x97a   : > { %v3539_v49 = vsub.f32 %v3497_v7, %v1937_v14  ;;  %v3542_v1 = vsub.f32 %v3502_v21, %v1936_v23  ;;  %v1959_v32 = vsel %vm524_vm0, %v1951_v18, 0.0  ;;  %v2551_v18 = vld [vmem:[%s3693_s8] ss:$0 sm:$0xff] }
 0x97b   : > { %v1922_v56 = vpop.xlane.xlu0 %1921  ;;  %1960 = vadd.xlane.f32.xlu0 %v1959_v32 }
 0x97c   : > { %v1938_v58 = vmul.f32 0.03125, %v1922_v56  ;;  %v1952_v26 = vmul.f32 %v3542_v1, %v3542_v1  ;;  %v1953_v25 = vmul.f32 %v3539_v49, %v3539_v49 }
 0x97e   : > { %v3550_v15 = vsub.f32 %v3505_v53, %v1938_v58  ;;  %v1962_v59 = vsel %vm524_vm0, %v1952_v26, 0.0  ;;  %v1965_v41 = vsel %vm524_vm0, %v1953_v25, 0.0 }
 0x97f   : > { %1963 = vadd.xlane.f32.xlu1 %v1962_v59  ;;  %1966 = vadd.xlane.f32.xlu0 %v1965_v41 }
 0x980   : > { %v1954_v55 = vmul.f32 %v3550_v15, %v3550_v15 }
 0x982   : > { %v1968_v62 = vsel %vm524_vm0, %v1954_v55, 0.0 }
 0x983   : > { %1969 = vadd.xlane.f32.xlu1 %v1968_v62 }
 0x9b0   : > { %v1925_v31 = vpop.xlane.xlu0 %1924 }
 0x9b1   : > { %v1939_v35 = vmul.f32 0.03125, %v1925_v31 }
 0x9b3   : > { %v3564_v29 = vsub.f32 %v3514_v5, %v1939_v35 }
 0x9b4   : > { %v1928_v39 = vpop.xlane.xlu1 %1927  ;;  %v1931_v48 = vpop.xlane.xlu0 %1930 }
 0x9b5   : > { %v1940_v36 = vmul.f32 0.03125, %v1928_v39  ;;  %v1941_v57 = vmul.f32 0.03125, %v1931_v48  ;;  %v1955_v0 = vmul.f32 %v3564_v29, %v3564_v29 }
 0x9b7   : > { %v3569_v6 = vsub.f32 %v3522_v51, %v1940_v36  ;;  %v3572_v8 = vsub.f32 %v3517_v34, %v1941_v57  ;;  %v1971_v40 = vsel %vm524_vm0, %v1955_v0, 0.0 }
 0x9b8   : > { %v1934_v47 = vpop.xlane.xlu1 %1933  ;;  %1972 = vadd.xlane.f32.xlu0 %v1971_v40 }
 0x9b9   : > { %v1942_v45 = vmul.f32 0.03125, %v1934_v47  ;;  %v1956_v9 = vmul.f32 %v3569_v6, %v3569_v6  ;;  %v1957_v43 = vmul.f32 %v3572_v8, %v3572_v8 }
 0x9bb   : > { %v3580_v13 = vsub.f32 %v3525_v46, %v1942_v45  ;;  %v1974_v33 = vsel %vm524_vm0, %v1956_v9, 0.0  ;;  %v1977_v20 = vsel %vm524_vm0, %v1957_v43, 0.0 }
 0x9bc   : > { %1975 = vadd.xlane.f32.xlu1 %v1974_v33  ;;  %1978 = vadd.xlane.f32.xlu0 %v1977_v20 }
 0x9bd   : > { %v1958_v52 = vmul.f32 %v3580_v13, %v3580_v13 }
 0x9bf   : > { %v1980_v2 = vsel %vm524_vm0, %v1958_v52, 0.0 }
 0x9c0   : > { %1981 = vadd.xlane.f32.xlu1 %v1980_v2 }
 0xa04   : > { %v1961_v38 = vpop.xlane.xlu0 %1960 }
 0xa05   : > { %v1983_v3 = vmul.f32 0.03125, %v1961_v38 }
 0xa07   : > { %v1991_v22 = vadd.f32 1e-05, %v1983_v3 }
 0xa08   : > { %v1964_v60 = vpop.xlane.xlu1 %1963  ;;  %v1967_v27 = vpop.xlane.xlu0 %1966 }
 0xa09   : > { %2967 = vrsqrt.f32 %v1991_v22  ;;  %v1984_v4 = vmul.f32 0.03125, %v1964_v60  ;;  %v1985_v28 = vmul.f32 0.03125, %v1967_v27 }
 0xa0b   : > { %v1992_v19 = vadd.f32 1e-05, %v1984_v4  ;;  %v1993_v30 = vadd.f32 1e-05, %v1985_v28 }
 0xa0c   : > { %v1970_v37 = vpop.xlane.xlu1 %1969 }
 0xa0d   : > { %2969 = vrsqrt.f32 %v1992_v19  ;;  %v1986_v44 = vmul.f32 0.03125, %v1970_v37  ;;  %v2882_v37 = vld [vmem:[%s3696_s11 + $0x20] sm:$0xff]  }
 0xa0e   : > { %2971 = vrsqrt.f32 %v1993_v30 }
 0xa0f   : > { %v1994_v11 = vadd.f32 1e-05, %v1986_v44  ;;  %v2883_v44 = vld [vmem:[%s3696_s11 + $0x18] sm:$0xff]  }
 0xa11   : > { %2973 = vrsqrt.f32 %v1994_v11  ;;  %v2884_v11 = vld [vmem:[%s3696_s11 + $0x10] sm:$0xff]  }
 0xa16   : > { %v2968_v24 = vpop.eup %2967 }
 0xa17   : > { %v2007_v16 = vmul.f32 %v2968_v24, %v3534_v12  ;;  %v2885_v24 = vld [vmem:[%s3696_s11 + $0x8] sm:$0xff]  }
 0xa19   : > { %v2021_v14 = vmul.f32 %v2550_v61, %v2007_v16  ;;  %v2886_v16 = vld [vmem:[%s3696_s11] sm:$0xff]  }
 0xa1a   : > { %v2970_v50 = vpop.eup %2969 }
 0xa1b   : > { %v2972_v54 = vpop.eup %2971  ;;  %v2008_v17 = vmul.f32 %v2970_v50, %v3542_v1  ;;  %v2035_v12 = vadd.f32 %v2551_v18, %v2021_v14 }
 0xa1c   : > { %v2009_v23 = vmul.f32 %v2972_v54, %v3539_v49 }
 0xa1d   : > { %v2022_v32 = vmul.f32 %v2550_v61, %v2008_v17 }
 0xa1e   : > { %v2974_v56 = vpop.eup %2973  ;;  %v2023_v25 = vmul.f32 %v2550_v61, %v2009_v23 }
 0xa1f   : > { %v2010_v58 = vmul.f32 %v2974_v56, %v3550_v15  ;;  %v2036_v26 = vadd.f32 %v2551_v18, %v2022_v32 }
 0xa20   : > { %v2037_v55 = vadd.f32 %v2551_v18, %v2023_v25 }
 0xa21   : > { %v2043_v59 = vpack.c.bf16 %v2036_v26, %v2035_v12  ;;  %v2024_v41 = vmul.f32 %v2550_v61, %v2010_v58 }
 0xa23   : > { %2790 = vmatprep.mubr.msk.bf16.mxu1 %vm524_vm0, %v2043_v59  ;;  %v2038_v1 = vadd.f32 %v2551_v18, %v2024_v41 }
 0xa25   : > { %v2044_v62 = vpack.c.bf16 %v2038_v1, %v2037_v55 }
 0xa27   : > { %2791 = vmatmul.mubr.msk.bf16.vlgmr.msra.gmra.mxu1 %vm524_vm0, %v2044_v62 }
 0xa41   : > { %v1973_v49 = vpop.xlane.xlu0 %1972 }
 0xa42   : > { %v1987_v63 = vmul.f32 0.03125, %v1973_v49 }
 0xa44   : > { %v1995_v42 = vadd.f32 1e-05, %v1987_v63 }
 0xa45   : > { %v1976_v31 = vpop.xlane.xlu1 %1975  ;;  %v1979_v35 = vpop.xlane.xlu0 %1978 }
 0xa46   : > { %2975 = vrsqrt.f32 %v1995_v42  ;;  %v1988_v39 = vmul.f32 0.03125, %v1976_v31  ;;  %v1989_v15 = vmul.f32 0.03125, %v1979_v35 }
 0xa48   : > { %v1996_v48 = vadd.f32 1e-05, %v1988_v39  ;;  %v1997_v36 = vadd.f32 1e-05, %v1989_v15 }
 0xa49   : > { %v1982_v57 = vpop.xlane.xlu1 %1981 }
 0xa4a   : > { %2977 = vrsqrt.f32 %v1996_v48  ;;  %v1990_v0 = vmul.f32 0.03125, %v1982_v57 }
 0xa4b   : > { %2979 = vrsqrt.f32 %v1997_v36 }
 0xa4c   : > { %v1998_v40 = vadd.f32 1e-05, %v1990_v0 }
 0xa4e   : > { %2981 = vrsqrt.f32 %v1998_v40 }
 0xa53   : > { %v2976_v47 = vpop.eup %2975 }
 0xa54   : > { %v2011_v45 = vmul.f32 %v2976_v47, %v3564_v29 }
 0xa56   : > { %v2025_v20 = vmul.f32 %v2550_v61, %v2011_v45 }
 0xa57   : > { %v2978_v9 = vpop.eup %2977 }
 0xa58   : > { %v2980_v43 = vpop.eup %2979  ;;  %v2012_v33 = vmul.f32 %v2978_v9, %v3569_v6  ;;  %v2039_v3 = vadd.f32 %v2551_v18, %v2025_v20  ;;  %v2879_v6 = vld [vmem:[%s3696_s11 + $0x38] sm:$0xff]  }
 0xa59   : > { %v2013_v52 = vmul.f32 %v2980_v43, %v3572_v8  ;;  %2798 = vmatprep.subr.bf16.mxu0 %v2879_v6  ;;  %v2880_v8 = vld [vmem:[%s3696_s11 + $0x30] sm:$0xff]  }
 0xa5a   : > { %v2026_v2 = vmul.f32 %v2550_v61, %v2012_v33  ;;  %2799 = vmatpush3.bf16.msra.mxu0 %v2879_v6 }
 0xa5b   : > { %v2982_v38 = vpop.eup %2981  ;;  %v2027_v27 = vmul.f32 %v2550_v61, %v2013_v52  ;;  %2800 = vmatprep.subr.bf16.mxu0 %v2880_v8 }
 0xa5c   : > { %v2040_v22 = vadd.f32 %v2551_v18, %v2026_v2  ;;  %v2014_v60 = vmul.f32 %v2982_v38, %v3580_v13  ;;  %v2881_v13 = vld [vmem:[%s3696_s11 + $0x28] sm:$0xff]  }
 0xa5d   : > { %v2041_v19 = vadd.f32 %v2551_v18, %v2027_v27 }
 0xa5e   : > { %v2045_v4 = vpack.c.bf16 %v2040_v22, %v2039_v3  ;;  %v2028_v28 = vmul.f32 %v2550_v61, %v2014_v60  ;;  %2801 = vmatpush3.bf16.msra.mxu0 %v2880_v8  ;;  %v3632_v61 = vld [vmem:[%s3695_s10] ss:$0 sm:$0xff] }
 0xa5f   : > { %2802 = vmatprep.subr.bf16.mxu0 %v2881_v13 }
 0xa60   : > { %2794 = vmatprep.mubr.msk.bf16.mxu1 %vm524_vm0, %v2045_v4  ;;  %v2042_v29 = vadd.f32 %v2551_v18, %v2028_v28 }
 0xa62   : > { %v2046_v30 = vpack.c.bf16 %v2042_v29, %v2041_v19  ;;  %2803 = vmatpush3.bf16.msra.mxu0 %v2881_v13 }
 0xa63   : > { %2804 = vmatprep.subr.bf16.mxu0 %v2882_v37 }
 0xa64   : > { %2795 = vmatmul.mubr.msk.bf16.gmra.mxu1 %vm524_vm0, %v2046_v30 }
 0xa66   : > { %2805 = vmatpush3.bf16.msra.mxu0 %v2882_v37 }
 0xa67   : > { %2806 = vmatprep.subr.bf16.mxu0 %v2883_v44 }
 0xa6a   : > { %2807 = vmatpush3.bf16.msra.mxu0 %v2883_v44 }
 0xa6b   : > { %2808 = vmatprep.subr.bf16.mxu0 %v2884_v11 }
 0xa6e   : > { %2809 = vmatpush3.bf16.msra.mxu0 %v2884_v11 }
 0xa6f   : > { %2810 = vmatprep.subr.bf16.mxu0 %v2885_v24 }
 0xa72   : > { %2811 = vmatpush3.bf16.msra.mxu0 %v2885_v24 }
 0xa73   : > { %2812 = vmatprep.subr.bf16.mxu0 %v2886_v16 }
 0xa76   : > { %2813 = vmatpush3.bf16.msra.mxu0 %v2886_v16 }
 0xae7   : > { %v2792_v50 = vpop.f32.mrf.mxu1 }
 0xae8   : > { %v2125_v54 = vadd.f32 %v2792_v50, %v3632_v61 }
 0xae9   : > { %v2116_v17 = vpop.f32.mrf.mxu1 }
 0xaea   : > { %v2157_v14 = vmul.f32 0.044715, %v2125_v54  ;;  %v2117_v23 = vadd.f32 %v3632_v61, %v2116_v17  ;;  %v2149_v22 = vmul.f32 0.5, %v2125_v54 }
 0xaeb   : > { %v2793_v18 = vpop.f32.mrf.mxu1 }
 0xaec   : > { %v2165_v32 = vmul.f32 %v2157_v14, %v2125_v54  ;;  %v2155_v56 = vmul.f32 0.044715, %v2117_v23  ;;  %v2128_v58 = vadd.f32 %v2793_v18, %v3632_v61  ;;  %v2147_v2 = vmul.f32 0.5, %v2117_v23 }
 0xaed   : > { %v2119_v12 = vpop.f32.mrf.mxu1 }
 0xaee   : > { %v2173_v26 = vmul.f32 %v2165_v32, %v2125_v54  ;;  %v2163_v25 = vmul.f32 %v2155_v56, %v2117_v23  ;;  %v2158_v59 = vmul.f32 0.044715, %v2128_v58  ;;  %v2120_v41 = vadd.f32 %v3632_v61, %v2119_v12 }
 0xaef   : > { %v2150_v20 = vmul.f32 0.5, %v2128_v58 }
 0xaf0   : > { %v2181_v55 = vadd.f32 %v2173_v26, %v2125_v54  ;;  %v2171_v1 = vmul.f32 %v2163_v25, %v2117_v23  ;;  %v2166_v62 = vmul.f32 %v2158_v59, %v2128_v58  ;;  %v2156_v49 = vmul.f32 0.044715, %v2120_v41 }
 0xaf1   : > { %v2148_v38 = vmul.f32 0.5, %v2120_v41 }
 0xaf2   : > { %v2189_v63 = vmul.f32 0.7978846, %v2181_v55  ;;  %v2174_v42 = vmul.f32 %v2166_v62, %v2128_v58  ;;  %v2179_v31 = vadd.f32 %v2171_v1, %v2117_v23  ;;  %v2164_v35 = vmul.f32 %v2156_v49, %v2120_v41 }
 0xaf4   : > { %v2182_v39 = vadd.f32 %v2174_v42, %v2128_v58  ;;  %v2187_v15 = vmul.f32 0.7978846, %v2179_v31  ;;  %v2172_v48 = vmul.f32 %v2164_v35, %v2120_v41  ;;  %2983 = vtanh.f32 %v2189_v63 }
 0xaf6   : > { %v2190_v36 = vmul.f32 0.7978846, %v2182_v39  ;;  %v2180_v57 = vadd.f32 %v2172_v48, %v2120_v41  ;;  %2985 = vtanh.f32 %v2187_v15 }
 0xaf8   : > { %2987 = vtanh.f32 %v2190_v36  ;;  %v2188_v0 = vmul.f32 0.7978846, %v2180_v57 }
 0xafa   : > { %2989 = vtanh.f32 %v2188_v0 }
 0xb01   : > { %v2984_v40 = vpop.eup %2983 }
 0xb02   : > { %v2205_v52 = vadd.f32 1.0, %v2984_v40 }
 0xb03   : > { %v2986_v47 = vpop.eup %2985 }
 0xb04   : > { %v2203_v43 = vadd.f32 1.0, %v2986_v47  ;;  %v2213_v28 = vmul.f32 %v2205_v52, %v2149_v22 }
 0xb05   : > { %v2988_v45 = vpop.eup %2987 }
 0xb06   : > { %v2206_v9 = vadd.f32 1.0, %v2988_v45  ;;  %v2211_v27 = vmul.f32 %v2203_v43, %v2147_v2  ;;  %v2559_v2 = vld [vmem:[%s3697_s12] ss:$0 sm:$0xff] }
 0xb07   : > { %v2990_v33 = vpop.eup %2989 }
 0xb08   : > { %v2204_v3 = vadd.f32 1.0, %v2990_v33  ;;  %v2214_v60 = vmul.f32 %v2206_v9, %v2150_v20 }
 0xb0a   : > { %v2212_v4 = vmul.f32 %v2204_v3, %v2148_v38  ;;  %v2220_v29 = vpack.c.bf16 %v2214_v60, %v2213_v28 }
 0xb0c   : > { %v2219_v19 = vpack.c.bf16 %v2212_v4, %v2211_v27 }
 0xb0e   : > { %2814 = vmatprep.mubr.bf16.mxu0 %v2219_v19 }
 0xb0f   : > { %2815 = vmatmul.mubr.bf16.vlgmr.msra.gmra.mxu0 %v2220_v29 }
 0xb24   : > { %v2796_v30 = vpop.f32.mrf.mxu1 }
 0xb25   : > { %v2141_v6 = vadd.f32 %v2796_v30, %v3632_v61 }
 0xb26   : > { %v2132_v8 = vpop.f32.mrf.mxu1 }
 0xb27   : > { %v2161_v13 = vmul.f32 0.044715, %v2141_v6  ;;  %v2133_v37 = vadd.f32 %v3632_v61, %v2132_v8  ;;  %v2153_v47 = vmul.f32 0.5, %v2141_v6 }
 0xb28   : > { %v2797_v44 = vpop.f32.mrf.mxu1 }
 0xb29   : > { %v2169_v11 = vmul.f32 %v2161_v13, %v2141_v6  ;;  %v2159_v24 = vmul.f32 0.044715, %v2133_v37  ;;  %v2144_v16 = vadd.f32 %v2797_v44, %v3632_v61  ;;  %v2151_v57 = vmul.f32 0.5, %v2133_v37 }
 0xb2a   : > { %v2135_v50 = vpop.f32.mrf.mxu1 }
 0xb2b   : > { %v2177_v54 = vmul.f32 %v2169_v11, %v2141_v6  ;;  %v2167_v17 = vmul.f32 %v2159_v24, %v2133_v37  ;;  %v2162_v14 = vmul.f32 0.044715, %v2144_v16  ;;  %v2136_v23 = vadd.f32 %v3632_v61, %v2135_v50 }
 0xb2c   : > { %v2154_v48 = vmul.f32 0.5, %v2144_v16 }
 0xb2d   : > { %v2175_v18 = vmul.f32 %v2167_v17, %v2133_v37  ;;  %v2170_v32 = vmul.f32 %v2162_v14, %v2144_v16  ;;  %v2160_v56 = vmul.f32 0.044715, %v2136_v23  ;;  %v2185_v58 = vadd.f32 %v2177_v54, %v2141_v6 }
 0xb2e   : > { %v2152_v0 = vmul.f32 0.5, %v2136_v23 }
 0xb2f   : > { %v2178_v12 = vmul.f32 %v2170_v32, %v2144_v16  ;;  %v2168_v26 = vmul.f32 %v2160_v56, %v2136_v23  ;;  %v2183_v25 = vadd.f32 %v2175_v18, %v2133_v37  ;;  %v2193_v59 = vmul.f32 0.7978846, %v2185_v58 }
 0xb31   : > { %v2176_v41 = vmul.f32 %v2168_v26, %v2136_v23  ;;  %v2191_v55 = vmul.f32 0.7978846, %v2183_v25  ;;  %v2186_v1 = vadd.f32 %v2178_v12, %v2144_v16 }
 0xb33   : > { %v2184_v62 = vadd.f32 %v2176_v41, %v2136_v23  ;;  %2991 = vtanh.f32 %v2191_v55  ;;  %v2194_v49 = vmul.f32 0.7978846, %v2186_v1 }
 0xb34   : > { %2993 = vtanh.f32 %v2193_v59 }
 0xb35   : > { %v2192_v63 = vmul.f32 0.7978846, %v2184_v62  ;;  %2995 = vtanh.f32 %v2194_v49 }
 0xb37   : > { %2997 = vtanh.f32 %v2192_v63 }
 0xb40   : > { %v2992_v42 = vpop.eup %2991 }
 0xb41   : > { %v2994_v61 = vpop.eup %2993  ;;  %v2207_v35 = vadd.f32 1.0, %v2992_v42 }
 0xb42   : > { %v2996_v31 = vpop.eup %2995  ;;  %v2209_v36 = vadd.f32 1.0, %v2994_v61 }
 0xb43   : > { %v2210_v39 = vadd.f32 1.0, %v2996_v31  ;;  %v2215_v9 = vmul.f32 %v2207_v35, %v2151_v57 }
 0xb44   : > { %v2998_v15 = vpop.eup %2997  ;;  %v2217_v33 = vmul.f32 %v2209_v36, %v2153_v47 }
 0xb45   : > { %v2208_v40 = vadd.f32 1.0, %v2998_v15  ;;  %v2218_v45 = vmul.f32 %v2210_v39, %v2154_v48 }
 0xb47   : > { %v2216_v43 = vmul.f32 %v2208_v40, %v2152_v0  ;;  %v2222_v52 = vpack.c.bf16 %v2218_v45, %v2217_v33 }
 0xb49   : > { %v2221_v20 = vpack.c.bf16 %v2216_v43, %v2215_v9 }
 0xb4b   : > { %2818 = vmatprep.mubr.bf16.mxu0 %v2221_v20 }
 0xb4c   : > { %2819 = vmatmul.mubr.bf16.gmra.mxu0 %v2222_v52 }
 0xbcf   : > { %v2816_v38 = vpop.f32.mrf.mxu0 }
 0xbd0   : > { %v2337_v3 = vadd.f32 %v2816_v38, %v2559_v2 }
 0xbd1   : > { %v2328_v22 = vpop.f32.mrf.mxu0 }
 0xbd2   : > { %v2361_v60 = vadd.f32 %v2337_v3, %v3497_v7  ;;  %v2329_v27 = vadd.f32 %v2559_v2, %v2328_v22 }
 0xbd3   : > { %v2817_v4 = vpop.f32.mrf.mxu0 }
 0xbd4   : > { %v2582_v28 = vpack.c.bf16 %v2361_v60, %v2361_v60  ;;  %v2359_v19 = vadd.f32 %v2329_v27, %v3494_v10  ;;  %v2340_v29 = vadd.f32 %v2817_v4, %v2559_v2 }
 0xbd5   : > { %v2331_v30 = vpop.f32.mrf.mxu0 }
 0xbd6   : > { %2402 = vst.msk [vmem:[%s3651_s20 + $0x8] sm:$0xf] %vm2399_vm4, %v2582_v28  ;;  %v2580_v7 = vpack.c.bf16 %v2359_v19, %v2359_v19  ;;  %v2362_v6 = vadd.f32 %v2340_v29, %v3505_v53  ;;  %v2332_v8 = vadd.f32 %v2559_v2, %v2331_v30 }
 0xbd8   : > { %2400 = vst.msk [vmem:[%s3651_s20] sm:$0xf] %vm2399_vm4, %v2580_v7  ;;  %v2583_v13 = vpack.c.bf16 %v2362_v6, %v2362_v6  ;;  %v2360_v37 = vadd.f32 %v2332_v8, %v3502_v21 }
 0xbda   : > { %2403 = vst.msk [vmem:[%s3651_s20 + $0xc] sm:$0xf] %vm2399_vm4, %v2583_v13  ;;  %v2581_v44 = vpack.c.bf16 %v2360_v37, %v2360_v37 }
 0xbdc   : > { %2401 = vst.msk [vmem:[%s3651_s20 + $0x4] sm:$0xf] %vm2399_vm4, %v2581_v44 }
 0xc0c   : > { %v2820_v10 = vpop.f32.mrf.mxu0 }
 0xc0d   : > { %v2353_v11 = vadd.f32 %v2820_v10, %v2559_v2 }
 0xc0e   : > { %v2344_v24 = vpop.f32.mrf.mxu0 }
 0xc0f   : > { %v2365_v16 = vadd.f32 %v2353_v11, %v3517_v34  ;;  %v2345_v53 = vadd.f32 %v2559_v2, %v2344_v24 }
 0xc10   : > { %v2821_v50 = vpop.f32.mrf.mxu0 }
 0xc11   : > { %v2586_v54 = vpack.c.bf16 %v2365_v16, %v2365_v16  ;;  %v2363_v17 = vadd.f32 %v2345_v53, %v3514_v5  ;;  %v2356_v14 = vadd.f32 %v2821_v50, %v2559_v2 }
 0xc12   : > { %v2347_v21 = vpop.f32.mrf.mxu0 }
 0xc13   : > { %2406 = vst.msk [vmem:[%s3651_s20 + $0x18] sm:$0xf] %vm2399_vm4, %v2586_v54  ;;  %v2584_v23 = vpack.c.bf16 %v2363_v17, %v2363_v17  ;;  %v2366_v18 = vadd.f32 %v2356_v14, %v3525_v46  ;;  %v2348_v32 = vadd.f32 %v2559_v2, %v2347_v21 }
 0xc15   : > { %2404 = vst.msk [vmem:[%s3651_s20 + $0x10] sm:$0xf] %vm2399_vm4, %v2584_v23  ;;  %v2587_v56 = vpack.c.bf16 %v2366_v18, %v2366_v18  ;;  %v2364_v58 = vadd.f32 %v2348_v32, %v3522_v51 }
 0xc17   : > { %2407 = vst.msk [vmem:[%s3651_s20 + $0x1c] sm:$0xf] %vm2399_vm4, %v2587_v56  ;;  %v2585_v34 = vpack.c.bf16 %v2364_v58, %v2364_v58 }
 0xc19   : > { %2405 = vst.msk [vmem:[%s3651_s20 + $0x14] sm:$0xf] %vm2399_vm4, %v2585_v34 }
 0xc1a PF: > { %s23_s27 = sadd.s32 1, %s3021_s27   ;;  %s3699_s25 = smov %s3017_s26 }
 0xc1b   : > { %p20_p5 = scmp.ge.s32.totalorder %s23_s27, 4   ;;  %s3700_s26 = smov %s3702_s28 }
 0xc1d   :  { %22 = sbr.rel (!%p20_p5) target bundleno = 2 (0x2), region = 105 }

</bundles_post_ra>
